<compile_context>
chip_gen: v6e
topology: v6e:2x2x1
jax: 0.10.0
libtpu: 0.0.40
codegen_flags: <defaults>
</compile_context>

<pallas_src>
import jax
import jax.numpy as jnp
from jax.experimental import pallas as pl
from jax.experimental.pallas import tpu as pltpu

IN_DIM = 28 * 28        # 784 (divisible by 8 -> legal full-dim block)
HID = 512
OUT_DIM = 10
OUT_PAD = 128           # lane-dense output width (sliced back to 10 outside)


def _round_up(x, m):
    return ((x + m - 1) // m) * m


def _cdiv(a, b):
    return (a + b - 1) // b


def mlp_kernel(x_ref, w1_ref, b1_ref, w2_ref, b2_ref, w3_ref, b3_ref, o_ref):
    """Full 3-layer MLP hot path on the MXU/VPU.

    x_ref:  (TB, 784)   VMEM bf16
    w1_ref: (784, 512)  VMEM bf16,                       b1_ref: (1, 512) f32
    w2_ref: (512, 512)  VMEM bf16,                       b2_ref: (1, 512) f32
    w3_ref: (512, 128)  VMEM bf16 (cols 10.. are zero),  b3_ref: (1, 128) f32
    o_ref:  (TB, 128)   VMEM f32 (lane-dense; cols 10.. are pad)
    """
    x = x_ref[...]
    # Linear(784 -> 512) + ReLU  (bf16 MXU, f32 accumulate, f32 bias/ReLU on VPU)
    h1 = jnp.dot(x, w1_ref[...], preferred_element_type=jnp.float32) + b1_ref[...]
    h1 = jnp.maximum(h1, 0.0).astype(jnp.bfloat16)
    # Linear(512 -> 512) + ReLU
    h2 = jnp.dot(h1, w2_ref[...], preferred_element_type=jnp.float32) + b2_ref[...]
    h2 = jnp.maximum(h2, 0.0).astype(jnp.bfloat16)
    # Linear(512 -> 10), padded to 128 output lanes (unmasked vst)
    logits = jnp.dot(h2, w3_ref[...], preferred_element_type=jnp.float32) + b3_ref[...]
    o_ref[...] = logits


def prepare_params(params):
    """One-time weight prep (hoisted out of the forward path).

    Casts weights to bf16, keeps biases in f32, pads the last layer's output
    dim 10 -> 128 so the kernel's output is lane-dense.
    """
    w1, b1, w2, b2, w3, b3 = params
    w1p = w1.astype(jnp.bfloat16)                                        # (784, 512)
    w2p = w2.astype(jnp.bfloat16)                                        # (512, 512)
    w3p = jnp.pad(w3, ((0, 0), (0, OUT_PAD - OUT_DIM))).astype(jnp.bfloat16)  # (512, 128)
    b1p = b1.astype(jnp.float32)                                         # (1, 512)
    b2p = b2.astype(jnp.float32)                                         # (1, 512)
    b3p = jnp.pad(b3, ((0, 0), (0, OUT_PAD - OUT_DIM))).astype(jnp.float32)   # (1, 128)
    return w1p, b1p, w2p, b2p, w3p, b3p


def _batch_tiling(B, tb_max):
    """Pick (tile, padded_batch): 16-aligned, balanced, >=2 steps when possible."""
    b16 = _round_up(max(B, 1), 16)            # bf16 native (16,128) packing
    tb_max = max(16, (tb_max // 16) * 16)
    n = _cdiv(b16, tb_max)
    # Prefer >=2 grid steps when the batch allows it, so the "parallel" batch
    # axis actually shards across both TensorCores on v7x.
    if n < 2 and b16 >= 32:
        n = 2
    # Balance tiles so unlucky batch sizes don't run a nearly-empty last tile.
    tb = _round_up(_cdiv(b16, n), 16)
    n = _cdiv(b16, tb)
    return tb, tb * n


def mlp_forward(x_nchw, prepared_params, *, tb=512):
    """x_nchw: (B, 1, 28, 28) float32 -> logits (B, 10) float32.

    `prepared_params` must come from prepare_params() (done once at init).
    """
    B = x_nchw.shape[0]
    # nn.Flatten(): flatten all dims except batch, row-major (C, H, W order).
    x = x_nchw.reshape(B, -1).astype(jnp.bfloat16)
    assert x.shape[1] == IN_DIM

    tb_eff, Bp = _batch_tiling(B, tb)
    if Bp > B:
        # Batch pad only (no K pad). Padded rows produce garbage logits
        # (ReLU(b1) path) but are sliced away below.
        x = jnp.pad(x, ((0, Bp - B), (0, 0)))

    w1p, b1p, w2p, b2p, w3p, b3p = prepared_params
    grid = (Bp // tb_eff,)

    def rep2(i):
        return (0, 0)

    flops = 2 * Bp * (IN_DIM * HID + HID * HID + HID * OUT_DIM)
    bytes_accessed = (
        Bp * IN_DIM * 2                                     # x bf16 in
        + (IN_DIM * HID + HID * HID + HID * OUT_PAD) * 2    # weights bf16
        + (HID + HID + OUT_PAD) * 4                         # biases f32
        + Bp * OUT_PAD * 4                                  # output slab f32
    )

    out = pl.pallas_call(
        mlp_kernel,
        out_shape=jax.ShapeDtypeStruct((Bp, OUT_PAD), jnp.float32),
        grid_spec=pltpu.PrefetchScalarGridSpec(
            num_scalar_prefetch=0,
            grid=grid,
            in_specs=[
                pl.BlockSpec((tb_eff, IN_DIM), lambda i: (i, 0)),  # x tile
                pl.BlockSpec((IN_DIM, HID), rep2),                 # W1 (full, resident)
                pl.BlockSpec((1, HID), rep2),                      # b1
                pl.BlockSpec((HID, HID), rep2),                    # W2
                pl.BlockSpec((1, HID), rep2),                      # b2
                pl.BlockSpec((HID, OUT_PAD), rep2),                # W3
                pl.BlockSpec((1, OUT_PAD), rep2),                  # b3
            ],
            out_specs=pl.BlockSpec((tb_eff, OUT_PAD), lambda i: (i, 0)),
        ),
        compiler_params=pltpu.CompilerParams(
            dimension_semantics=("parallel",),
            vmem_limit_bytes=32 * 1024 * 1024,  # clears v5e's 16 MiB scoped default
        ),
        cost_estimate=pl.CostEstimate(
            flops=flops, transcendentals=0, bytes_accessed=bytes_accessed),
    )(x, w1p, b1p, w2p, b2p, w3p, b3p)

    return out[:B, :OUT_DIM]


def init_params(key):
    """Deterministic init matching the nn.Linear shapes (synthetic weights)."""
    k1, k2, k3, k4, k5, k6 = jax.random.split(key, 6)

    def uinit(k, shape, fan_in):
        bound = 1.0 / jnp.sqrt(fan_in)
        return jax.random.uniform(k, shape, jnp.float32, -bound, bound)

    # Stored transposed vs. torch (in, out) so kernel does x @ W.
    w1 = uinit(k1, (IN_DIM, HID), IN_DIM)
    b1 = uinit(k2, (1, HID), IN_DIM)
    w2 = uinit(k3, (HID, HID), HID)
    b2 = uinit(k4, (1, HID), HID)
    w3 = uinit(k5, (HID, OUT_DIM), HID)
    b3 = uinit(k6, (1, OUT_DIM), HID)
    return (w1, b1, w2, b2, w3, b3)


def mlp_reference(x_nchw, params):
    """Pure-JAX reference (same bf16 MXU inputs / f32 accumulation)."""
    # TODO(synk): bf16 matmul inputs (f32 accumulate) deviate slightly from the
    # all-f32 torch module; acceptable at atol/rtol 2e-2 for this workload.
    w1, b1, w2, b2, w3, b3 = params
    x = x_nchw.reshape(x_nchw.shape[0], -1).astype(jnp.bfloat16)
    h1 = jnp.dot(x, w1.astype(jnp.bfloat16),
                 preferred_element_type=jnp.float32) + b1
    h1 = jnp.maximum(h1, 0.0).astype(jnp.bfloat16)
    h2 = jnp.dot(h1, w2.astype(jnp.bfloat16),
                 preferred_element_type=jnp.float32) + b2
    h2 = jnp.maximum(h2, 0.0).astype(jnp.bfloat16)
    return jnp.dot(h2, w3.astype(jnp.bfloat16),
                   preferred_element_type=jnp.float32) + b3


if __name__ == "__main__":
    key = jax.random.PRNGKey(0)
    kx, kp = jax.random.split(key)

    B = 16  # small batch, MNIST-shaped NCHW input
    x = jax.random.normal(kx, (B, 1, 28, 28), jnp.float32)
    params = init_params(kp)

    # One-time weight prep (hoisted out of the per-call forward path).
    prepared = jax.block_until_ready(prepare_params(params))

    fwd = jax.jit(mlp_forward)
    logits = jax.block_until_ready(fwd(x, prepared))

    ref = mlp_reference(x, params)
    assert logits.shape == (B, OUT_DIM), logits.shape
    max_err = float(jnp.max(jnp.abs(logits - ref)))
    assert jnp.allclose(logits, ref, atol=2e-2, rtol=2e-2), max_err

    print("KERNEL_OK")
</pallas_src>

<mosaic_0001>
module attributes {stable_mosaic.version = 11 : i64} {
  func.func @mlp_kernel(%arg0: i32, %arg1: memref<16x784xbf16, #tpu.memory_space<vmem>>, %arg2: memref<784x512xbf16, #tpu.memory_space<vmem>>, %arg3: memref<1x512xf32, #tpu.memory_space<vmem>>, %arg4: memref<512x512xbf16, #tpu.memory_space<vmem>>, %arg5: memref<1x512xf32, #tpu.memory_space<vmem>>, %arg6: memref<512x128xbf16, #tpu.memory_space<vmem>>, %arg7: memref<1x128xf32, #tpu.memory_space<vmem>>, %arg8: memref<16x128xf32, #tpu.memory_space<vmem>>) attributes {dimension_semantics = [#tpu.dimension_semantics<parallel>], iteration_bounds = array<i64: 1>, scalar_prefetch = 0 : i64, scratch_operands = 0 : i64, tpu.core_type = #tpu.core_type<tc>, window_params = [{transform_indices = @transform_0, window_bounds = array<i64: 16, 784>}, {pipeline_mode = #tpu.pipeline_mode<synchronous>, transform_indices = @transform_1, window_bounds = array<i64: 784, 512>}, {pipeline_mode = #tpu.pipeline_mode<synchronous>, transform_indices = @transform_2, window_bounds = array<i64: 1, 512>}, {pipeline_mode = #tpu.pipeline_mode<synchronous>, transform_indices = @transform_3, window_bounds = array<i64: 512, 512>}, {pipeline_mode = #tpu.pipeline_mode<synchronous>, transform_indices = @transform_4, window_bounds = array<i64: 1, 512>}, {pipeline_mode = #tpu.pipeline_mode<synchronous>, transform_indices = @transform_5, window_bounds = array<i64: 512, 128>}, {pipeline_mode = #tpu.pipeline_mode<synchronous>, transform_indices = @transform_6, window_bounds = array<i64: 1, 128>}, {transform_indices = @transform_7, window_bounds = array<i64: 16, 128>}]} {
    %c0 = arith.constant 0 : index
    %c0_0 = arith.constant 0 : index
    %0 = vector.load %arg1[%c0, %c0_0] : memref<16x784xbf16, #tpu.memory_space<vmem>>, vector<16x784xbf16>
    %c0_1 = arith.constant 0 : index
    %c0_2 = arith.constant 0 : index
    %1 = vector.load %arg2[%c0_1, %c0_2] : memref<784x512xbf16, #tpu.memory_space<vmem>>, vector<784x512xbf16>
    %cst = arith.constant dense<0.000000e+00> : vector<16x512xf32>
    %2 = tpu.matmul %0, %1, %cst {dimension_numbers = #tpu.dot_dimension_numbers<[1], [0], [0], [1], [0, 0, 1, 1], [], []>} : vector<16x784xbf16>, vector<784x512xbf16>, vector<16x512xf32> -> vector<16x512xf32>
    %c0_3 = arith.constant 0 : index
    %c0_4 = arith.constant 0 : index
    %3 = vector.load %arg3[%c0_3, %c0_4] : memref<1x512xf32, #tpu.memory_space<vmem>>, vector<1x512xf32>
    %4 = vector.broadcast %3 : vector<1x512xf32> to vector<16x512xf32>
    %5 = arith.addf %2, %4 : vector<16x512xf32>
    %cst_5 = arith.constant 0.000000e+00 : f32
    %6 = vector.broadcast %cst_5 : f32 to vector<16x512xf32>
    %7 = arith.maximumf %5, %6 : vector<16x512xf32>
    %8 = arith.truncf %7 : vector<16x512xf32> to vector<16x512xbf16>
    %c0_6 = arith.constant 0 : index
    %c0_7 = arith.constant 0 : index
    %9 = vector.load %arg4[%c0_6, %c0_7] : memref<512x512xbf16, #tpu.memory_space<vmem>>, vector<512x512xbf16>
    %cst_8 = arith.constant dense<0.000000e+00> : vector<16x512xf32>
    %10 = tpu.matmul %8, %9, %cst_8 {dimension_numbers = #tpu.dot_dimension_numbers<[1], [0], [0], [1], [0, 0, 1, 1], [], []>} : vector<16x512xbf16>, vector<512x512xbf16>, vector<16x512xf32> -> vector<16x512xf32>
    %c0_9 = arith.constant 0 : index
    %c0_10 = arith.constant 0 : index
    %11 = vector.load %arg5[%c0_9, %c0_10] : memref<1x512xf32, #tpu.memory_space<vmem>>, vector<1x512xf32>
    %12 = vector.broadcast %11 : vector<1x512xf32> to vector<16x512xf32>
    %13 = arith.addf %10, %12 : vector<16x512xf32>
    %cst_11 = arith.constant 0.000000e+00 : f32
    %14 = vector.broadcast %cst_11 : f32 to vector<16x512xf32>
    %15 = arith.maximumf %13, %14 : vector<16x512xf32>
    %16 = arith.truncf %15 : vector<16x512xf32> to vector<16x512xbf16>
    %c0_12 = arith.constant 0 : index
    %c0_13 = arith.constant 0 : index
    %17 = vector.load %arg6[%c0_12, %c0_13] : memref<512x128xbf16, #tpu.memory_space<vmem>>, vector<512x128xbf16>
    %cst_14 = arith.constant dense<0.000000e+00> : vector<16x128xf32>
    %18 = tpu.matmul %16, %17, %cst_14 {dimension_numbers = #tpu.dot_dimension_numbers<[1], [0], [0], [1], [0, 0, 1, 1], [], []>} : vector<16x512xbf16>, vector<512x128xbf16>, vector<16x128xf32> -> vector<16x128xf32>
    %c0_15 = arith.constant 0 : index
    %c0_16 = arith.constant 0 : index
    %19 = vector.load %arg7[%c0_15, %c0_16] : memref<1x128xf32, #tpu.memory_space<vmem>>, vector<1x128xf32>
    %20 = vector.broadcast %19 : vector<1x128xf32> to vector<16x128xf32>
    %21 = arith.addf %18, %20 : vector<16x128xf32>
    %c0_17 = arith.constant 0 : index
    %c0_18 = arith.constant 0 : index
    %22 = vector.load %arg8[%c0_17, %c0_18] : memref<16x128xf32, #tpu.memory_space<vmem>>, vector<16x128xf32>
    tpu.vector_store %arg8[%c0_17, %c0_18], %21 {strides = array<i32>} : memref<16x128xf32, #tpu.memory_space<vmem>>, vector<16x128xf32>,
    return
  }
  func.func @transform_0(%arg0: i32) -> (i32, i32) {
    %c0_i32 = arith.constant 0 : i32
    %c0_i32_0 = arith.constant 0 : i32
    return %arg0, %c0_i32 : i32, i32
  }
  func.func @transform_1(%arg0: i32) -> (i32, i32) {
    %c0_i32 = arith.constant 0 : i32
    %c0_i32_0 = arith.constant 0 : i32
    %c0_i32_1 = arith.constant 0 : i32
    return %c0_i32, %c0_i32_0 : i32, i32
  }
  func.func @transform_2(%arg0: i32) -> (i32, i32) {
    %c0_i32 = arith.constant 0 : i32
    %c0_i32_0 = arith.constant 0 : i32
    %c0_i32_1 = arith.constant 0 : i32
    return %c0_i32, %c0_i32_0 : i32, i32
  }
  func.func @transform_3(%arg0: i32) -> (i32, i32) {
    %c0_i32 = arith.constant 0 : i32
    %c0_i32_0 = arith.constant 0 : i32
    %c0_i32_1 = arith.constant 0 : i32
    return %c0_i32, %c0_i32_0 : i32, i32
  }
  func.func @transform_4(%arg0: i32) -> (i32, i32) {
    %c0_i32 = arith.constant 0 : i32
    %c0_i32_0 = arith.constant 0 : i32
    %c0_i32_1 = arith.constant 0 : i32
    return %c0_i32, %c0_i32_0 : i32, i32
  }
  func.func @transform_5(%arg0: i32) -> (i32, i32) {
    %c0_i32 = arith.constant 0 : i32
    %c0_i32_0 = arith.constant 0 : i32
    %c0_i32_1 = arith.constant 0 : i32
    return %c0_i32, %c0_i32_0 : i32, i32
  }
  func.func @transform_6(%arg0: i32) -> (i32, i32) {
    %c0_i32 = arith.constant 0 : i32
    %c0_i32_0 = arith.constant 0 : i32
    %c0_i32_1 = arith.constant 0 : i32
    return %c0_i32, %c0_i32_0 : i32, i32
  }
  func.func @transform_7(%arg0: i32) -> (i32, i32) {
    %c0_i32 = arith.constant 0 : i32
    %c0_i32_0 = arith.constant 0 : i32
    return %arg0, %c0_i32 : i32, i32
  }
}

</mosaic_0001>

<bundles_post_ra>
// kernel: mlp_forward.1
= control target key start
LH: loop header
LB: loop body
LE: loop exit
PB: predicated region body
PF: predicated region fallthrough
CT: control target
= control target key end

     0   :  { %12 = vsyncpa [#allocation3], 0  ;;  %s4259_s0 = inlined_call_operand.vmem [shape: bf16[16,784], index: 0, kind: input, shape index: {}]   ;;  %s4260_s1 = inlined_call_operand.hbm [shape: bf16[784,512], index: 1, kind: input, shape index: {}]   ;;  %s4261_s2 = inlined_call_operand.vmem [shape: f32[1,512], index: 2, kind: input, shape index: {}]   ;;  %s4262_s3 = inlined_call_operand.hbm [shape: bf16[512,512], index: 3, kind: input, shape index: {}]   ;;  %s4263_s4 = inlined_call_operand.vmem [shape: f32[1,512], index: 4, kind: input, shape index: {}]   ;;  %s4264_s5 = inlined_call_operand.vmem [shape: bf16[512,128], index: 5, kind: input, shape index: {}]   ;;  %s4265_s6 = inlined_call_operand.vmem [shape: f32[1,128], index: 6, kind: input, shape index: {}]   ;;  %s4266_s7 = inlined_call_operand.hbm [shape: f32[16,128], index: 7, kind: output, shape index: {}]  }
   0x1   :  { %13 = vsyncpa [#allocation6], 0 }
   0x2   :  { %14 = vsyncpa [#allocation4], 0  ;;  %s4010_s24 = smov [#allocation2]  }
   0x3   :  { %s22_s25 = sshll.u32 %s4010_s24, 4  ;;  %s23_s25 = int_to_ptr.vmem [resolvable:$true] %s22_s25 }
   0x4   :  { %s3952_s26 = scalar_lea.vmem %s23_s25, 25088  ;;  %p3957_p1 = scmp.lt.s32.totalorder %s23_s25, %s23_s25 }
   0x5   :  { %p3953_p0 = scmp.ne.s32.totalorder %s23_s25, %s3952_s26  ;;  %p3958_p2 = scmp.lt.s32.totalorder %s3952_s26, %s3952_s26 }
   0x7   :  { %p3959_p3 = por %p3958_p2, %p3957_p1 }
   0x9   :  { %p3960_p4 = pnand %p3959_p3, %p3953_p0 }
   0xb   :  { %3963 = shalt.err (!%p3960_p4)
}
   0xc   :  { %s4011_s27 = smov 256   ;;  %s4012_s28 = smov 16  }
   0xd   :  { %28 = dma.hbm_to_vmem [thread:$0]  %s4260_s1, 25088, %s23_s25, [#allocation3], %s4011_s27, %s4011_s27, %s4012_s28  }
   0xe   :  { %s4013_s8 = smov [#allocation5]  }
   0xf   :  { %s36_s9 = sshll.u32 %s4013_s8, 4  ;;  %s37_s9 = int_to_ptr.vmem [resolvable:$true] %s36_s9 }
  0x10   :  { %s3972_s10 = scalar_lea.vmem %s37_s9, 16384  ;;  %p3977_p6 = scmp.lt.s32.totalorder %s37_s9, %s37_s9 }
  0x11   :  { %p3973_p5 = scmp.ne.s32.totalorder %s37_s9, %s3972_s10  ;;  %p3978_p7 = scmp.lt.s32.totalorder %s3972_s10, %s3972_s10 }
  0x13   :  { %p3979_p8 = por %p3978_p7, %p3977_p6 }
  0x15   :  { %p3980_p9 = pnand %p3979_p8, %p3973_p5 }
  0x17   :  { %3983 = shalt.err (!%p3980_p9)
}
  0x18   :  { %42 = dma.hbm_to_vmem [thread:$0]  %s4262_s3, 16384, %s37_s9, [#allocation6], %s4011_s27, %s4011_s27, %s4012_s28  }
  0x19   :  { %4004 = dma.done.wait [#allocation3], 25088  }
  0x1a   :  { %4005 = vsyncadd [#allocation3], 4294942208 }
  0x1b   :  { %4006 = dma.done.wait [#allocation6], 16384  }
  0x1c   :  { %4007 = vsyncadd [#allocation6], 4294950912  ;;  %v3414_v0 = vld [vmem:[#allocation2 + $0xe4] ss:$16 sps:$4 sm:$0xff]   ;;  %v3418_v2 = vld [vmem:[#allocation2 + $0xe0] ss:$16 sps:$4 sm:$0xff]  }
  0x1d   :  { %v3416_v1 = vld [vmem:[#allocation2 + $0x2e4] ss:$16 sps:$4 sm:$0xff]   ;;  %1301 = vmatprep.subr.bf16.mxu0 %v3414_v0  ;;  %v3419_v3 = vld [vmem:[#allocation2 + $0x2e0] ss:$16 sps:$4 sm:$0xff]   ;;  %v4072_v51 = vld [vmem:[%s4259_s0 + $0xc] ss:$28 sps:$4 sm:$0xff]  }
  0x1e   :  { %1344 = vmatprep.subr.bf16.mxu1 %v3416_v1  ;;  %v3420_v4 = vld [vmem:[#allocation2 + $0xc4] ss:$16 sps:$4 sm:$0xff]   ;;  %1302 = vmatpush1.bf16.msra.mxu0 %v3418_v2  ;;  %v3424_v6 = vld [vmem:[#allocation2 + $0xc0] ss:$16 sps:$4 sm:$0xff]   ;;  %vm1297_vm0 = vcmask 130048   ;;  %s4015_s16 = smov [#allocation7]  }
  0x1f   :  { %1345 = vmatpush1.bf16.msra.mxu1 %v3419_v3  ;;  %v3422_v5 = vld [vmem:[#allocation2 + $0x2c4] ss:$16 sps:$4 sm:$0xff]   ;;  %1303 = vmatprep.subr.bf16.mxu0 %v3420_v4  ;;  %v3425_v7 = vld [vmem:[#allocation2 + $0x2c0] ss:$16 sps:$4 sm:$0xff]   ;;  %s2983_s17 = sshll.u32 %s4015_s16, 4  ;;  %s2984_s17 = int_to_ptr.vmem [resolvable:$true] %s2983_s17 }
  0x20   :  { %1346 = vmatprep.subr.bf16.mxu1 %v3422_v5  ;;  %v3426_v8 = vld [vmem:[#allocation2 + $0xa4] ss:$16 sps:$4 sm:$0xff]   ;;  %v3430_v10 = vld [vmem:[#allocation2 + $0xa0] ss:$16 sps:$4 sm:$0xff]   ;;  %1376 = vmatprep.mubr.bf16.mxu1 %v4072_v51  ;;  %s3984_s18 = scalar_lea.vmem %s2984_s17, 256  ;;  %p3989_p11 = scmp.lt.s32.totalorder %s2984_s17, %s2984_s17 }
  0x21   :  { %v3428_v9 = vld [vmem:[#allocation2 + $0x2a4] ss:$16 sps:$4 sm:$0xff]   ;;  %v3431_v11 = vld [vmem:[#allocation2 + $0x2a0] ss:$16 sps:$4 sm:$0xff]   ;;  %p3985_p10 = scmp.ne.s32.totalorder %s2984_s17, %s3984_s18  ;;  %p3990_p12 = scmp.lt.s32.totalorder %s3984_s18, %s3984_s18 }
  0x22   :  { %1304 = vmatpush1.bf16.msra.mxu0 %v3424_v6  ;;  %v3432_v12 = vld [vmem:[#allocation2 + $0x84] ss:$16 sps:$4 sm:$0xff]   ;;  %v3436_v14 = vld [vmem:[#allocation2 + $0x80] ss:$16 sps:$4 sm:$0xff]  }
  0x23   :  { %1347 = vmatpush1.bf16.msra.mxu1 %v3425_v7  ;;  %1305 = vmatprep.subr.bf16.mxu0 %v3426_v8  ;;  %v3434_v13 = vld [vmem:[#allocation2 + $0x284] ss:$16 sps:$4 sm:$0xff]   ;;  %v3437_v15 = vld [vmem:[#allocation2 + $0x280] ss:$16 sps:$4 sm:$0xff]   ;;  %p3991_p13 = por %p3990_p12, %p3989_p11 }
  0x24   :  { %1348 = vmatprep.subr.bf16.mxu1 %v3428_v9  ;;  %v3438_v16 = vld [vmem:[#allocation2 + $0x64] ss:$16 sps:$4 sm:$0xff]   ;;  %v3442_v18 = vld [vmem:[#allocation2 + $0x60] ss:$16 sps:$4 sm:$0xff]   ;;  %v3527_v9 = vld [vmem:[#allocation2 + $0xec] ss:$16 sps:$4 sm:$0xff]  }
  0x25   :  { %v3440_v17 = vld [vmem:[#allocation2 + $0x264] ss:$16 sps:$4 sm:$0xff]   ;;  %v3443_v19 = vld [vmem:[#allocation2 + $0x260] ss:$16 sps:$4 sm:$0xff]   ;;  %p3992_p0 = pnand %p3991_p13, %p3985_p10 }
  0x26   :  { %1306 = vmatpush1.bf16.msra.mxu0 %v3430_v10  ;;  %v3444_v20 = vld [vmem:[#allocation2 + $0x44] ss:$16 sps:$4 sm:$0xff]   ;;  %v3448_v22 = vld [vmem:[#allocation2 + $0x40] ss:$16 sps:$4 sm:$0xff]  }
  0x27   :  { %1349 = vmatpush1.bf16.msra.mxu1 %v3431_v11  ;;  %1307 = vmatprep.subr.bf16.mxu0 %v3432_v12  ;;  %v3446_v21 = vld [vmem:[#allocation2 + $0x244] ss:$16 sps:$4 sm:$0xff]   ;;  %v3449_v23 = vld [vmem:[#allocation2 + $0x240] ss:$16 sps:$4 sm:$0xff]   ;;  %v4014_v11 = vmov 0  }
  0x28   :  { %1350 = vmatprep.subr.bf16.mxu1 %v3434_v13  ;;  %v3450_v24 = vld [vmem:[#allocation2 + $0x24] ss:$16 sps:$4 sm:$0xff]   ;;  %v3454_v26 = vld [vmem:[#allocation2 + $0x20] ss:$16 sps:$4 sm:$0xff]   ;;  %v3525_v13 = vld [vmem:[#allocation2 + $0xe8] ss:$16 sps:$4 sm:$0xff]  }
  0x29   :  { %v3452_v25 = vld [vmem:[#allocation2 + $0x224] ss:$16 sps:$4 sm:$0xff]   ;;  %v3455_v27 = vld [vmem:[#allocation2 + $0x220] ss:$16 sps:$4 sm:$0xff]  }
  0x2a   :  { %1308 = vmatpush1.bf16.msra.mxu0 %v3436_v14  ;;  %v3456_v28 = vld [vmem:[#allocation2 + $0x4] ss:$16 sps:$4 sm:$0xff]   ;;  %v3460_v30 = vld [vmem:[#allocation2] ss:$16 sps:$4 sm:$0xff]  }
  0x2b   :  { %1351 = vmatpush1.bf16.msra.mxu1 %v3437_v15  ;;  %1309 = vmatprep.subr.bf16.mxu0 %v3438_v16  ;;  %v3458_v29 = vld [vmem:[#allocation2 + $0x204] ss:$16 sps:$4 sm:$0xff]   ;;  %v3461_v31 = vld [vmem:[#allocation2 + $0x200] ss:$16 sps:$4 sm:$0xff]   ;;  %v3534_v16 = vld [vmem:[#allocation2 + $0xcc] ss:$16 sps:$4 sm:$0xff]  }
  0x2c   :  { %1352 = vmatprep.subr.bf16.mxu1 %v3440_v17  ;;  %v3462_v32 = vld [vmem:[#allocation2 + $0x1e4] ss:$16 sps:$4 sm:$0xff]   ;;  %v3466_v34 = vld [vmem:[#allocation2 + $0x1e0] ss:$16 sps:$4 sm:$0xff]  }
  0x2d   :  { %v3464_v33 = vld [vmem:[#allocation2 + $0x3e4] ss:$16 sps:$4 sm:$0xff]   ;;  %v3467_v35 = vld [vmem:[#allocation2 + $0x3e0] ss:$16 sps:$4 sm:$0xff]  }
  0x2e   :  { %1310 = vmatpush1.bf16.msra.mxu0 %v3442_v18  ;;  %v3468_v36 = vld [vmem:[#allocation2 + $0x1c4] ss:$16 sps:$4 sm:$0xff]   ;;  %v3472_v38 = vld [vmem:[#allocation2 + $0x1c0] ss:$16 sps:$4 sm:$0xff]   ;;  %v3532_v18 = vld [vmem:[#allocation2 + $0xc8] ss:$16 sps:$4 sm:$0xff]  }
  0x2f   :  { %1353 = vmatpush1.bf16.msra.mxu1 %v3443_v19  ;;  %1311 = vmatprep.subr.bf16.mxu0 %v3444_v20  ;;  %v3470_v37 = vld [vmem:[#allocation2 + $0x3c4] ss:$16 sps:$4 sm:$0xff]   ;;  %v3473_v39 = vld [vmem:[#allocation2 + $0x3c0] ss:$16 sps:$4 sm:$0xff]   ;;  %v3540_v20 = vld [vmem:[#allocation2 + $0xac] ss:$16 sps:$4 sm:$0xff]  }
  0x30   :  { %1354 = vmatprep.subr.bf16.mxu1 %v3446_v21  ;;  %v3474_v40 = vld [vmem:[#allocation2 + $0x1a4] ss:$16 sps:$4 sm:$0xff]   ;;  %v3478_v42 = vld [vmem:[#allocation2 + $0x1a0] ss:$16 sps:$4 sm:$0xff]  }
  0x31   :  { %v3476_v41 = vld [vmem:[#allocation2 + $0x3a4] ss:$16 sps:$4 sm:$0xff]   ;;  %v3479_v43 = vld [vmem:[#allocation2 + $0x3a0] ss:$16 sps:$4 sm:$0xff]  }
  0x32   :  { %1312 = vmatpush1.bf16.msra.mxu0 %v3448_v22  ;;  %v3480_v44 = vld [vmem:[#allocation2 + $0x184] ss:$16 sps:$4 sm:$0xff]   ;;  %v3484_v46 = vld [vmem:[#allocation2 + $0x180] ss:$16 sps:$4 sm:$0xff]   ;;  %v3538_v22 = vld [vmem:[#allocation2 + $0xa8] ss:$16 sps:$4 sm:$0xff]  }
  0x33   :  { %1355 = vmatpush1.bf16.msra.mxu1 %v3449_v23  ;;  %1313 = vmatprep.subr.bf16.mxu0 %v3450_v24  ;;  %v3482_v45 = vld [vmem:[#allocation2 + $0x384] ss:$16 sps:$4 sm:$0xff]   ;;  %v3485_v47 = vld [vmem:[#allocation2 + $0x380] ss:$16 sps:$4 sm:$0xff]   ;;  %v3546_v24 = vld [vmem:[#allocation2 + $0x8c] ss:$16 sps:$4 sm:$0xff]  }
  0x34   :  { %1356 = vmatprep.subr.bf16.mxu1 %v3452_v25  ;;  %v3486_v48 = vld [vmem:[#allocation2 + $0x164] ss:$16 sps:$4 sm:$0xff]   ;;  %v3490_v52 = vld [vmem:[#allocation2 + $0x160] ss:$16 sps:$4 sm:$0xff]  }
  0x35   :  { %v4067_v49 = vld [vmem:[%s4259_s0 + $0x4] ss:$28 sps:$4 sm:$0xff]   ;;  %v3531_v14 = vld [vmem:[%s4259_s0 + $0x18] ss:$28 sps:$4 sm:$0xff]  }
  0x36   :  { %1314 = vmatpush1.bf16.msra.mxu0 %v3454_v26  ;;  %v3488_v50 = vld [vmem:[#allocation2 + $0x364] ss:$16 sps:$4 sm:$0xff]   ;;  %1333 = vmatprep.mubr.bf16.mxu0 %v4067_v49  ;;  %v3491_v53 = vld [vmem:[#allocation2 + $0x360] ss:$16 sps:$4 sm:$0xff]   ;;  %v3544_v26 = vld [vmem:[#allocation2 + $0x88] ss:$16 sps:$4 sm:$0xff]  }
  0x37   :  { %1357 = vmatpush1.bf16.msra.mxu1 %v3455_v27  ;;  %1315 = vmatprep.subr.bf16.mxu0 %v3456_v28  ;;  %v3492_v54 = vld [vmem:[#allocation2 + $0x144] ss:$16 sps:$4 sm:$0xff]   ;;  %v3496_v56 = vld [vmem:[#allocation2 + $0x140] ss:$16 sps:$4 sm:$0xff]   ;;  %v3552_v28 = vld [vmem:[#allocation2 + $0x6c] ss:$16 sps:$4 sm:$0xff]  }
  0x38   :  { %1358 = vmatprep.subr.bf16.mxu1 %v3458_v29  ;;  %v3494_v55 = vld [vmem:[#allocation2 + $0x344] ss:$16 sps:$4 sm:$0xff]   ;;  %v3497_v57 = vld [vmem:[#allocation2 + $0x340] ss:$16 sps:$4 sm:$0xff]  }
  0x39   :  { %v3498_v58 = vld [vmem:[#allocation2 + $0x124] ss:$16 sps:$4 sm:$0xff]   ;;  %v3502_v60 = vld [vmem:[#allocation2 + $0x120] ss:$16 sps:$4 sm:$0xff]  }
  0x3a   :  { %1316 = vmatpush1.bf16.msra.mxu0 %v3460_v30  ;;  %v3500_v59 = vld [vmem:[#allocation2 + $0x324] ss:$16 sps:$4 sm:$0xff]   ;;  %v3503_v61 = vld [vmem:[#allocation2 + $0x320] ss:$16 sps:$4 sm:$0xff]   ;;  %v3550_v30 = vld [vmem:[#allocation2 + $0x68] ss:$16 sps:$4 sm:$0xff]  }
  0x3b   :  { %1359 = vmatpush1.bf16.msra.mxu1 %v3461_v31  ;;  %1317 = vmatprep.subr.bf16.mxu0 %v3462_v32  ;;  %v3504_v62 = vld [vmem:[#allocation2 + $0x104] ss:$16 sps:$4 sm:$0xff]   ;;  %v3508_v0 = vld [vmem:[#allocation2 + $0x100] ss:$16 sps:$4 sm:$0xff]   ;;  %v3558_v32 = vld [vmem:[#allocation2 + $0x4c] ss:$16 sps:$4 sm:$0xff]  }
  0x3c   :  { %1360 = vmatprep.subr.bf16.mxu1 %v3464_v33  ;;  %v3506_v63 = vld [vmem:[#allocation2 + $0x304] ss:$16 sps:$4 sm:$0xff]   ;;  %v3509_v1 = vld [vmem:[#allocation2 + $0x300] ss:$16 sps:$4 sm:$0xff]  }
  0x3d   :  { %v3518_v2 = vld [vmem:[#allocation2 + $0x4e4] ss:$16 sps:$4 sm:$0xff]   ;;  %v4079_v4 = vld [vmem:[%s4259_s0] ss:$28 sps:$4 sm:$0xff]  }
  0x3e   :  { %1318 = vmatpush2.bf16.msra.mxu0 %v3466_v34  ;;  %v3521_v3 = vld [vmem:[#allocation2 + $0x604] ss:$16 sps:$4 sm:$0xff]   ;;  %v3516_v6 = vld [vmem:[#allocation2 + $0x4e0] ss:$16 sps:$4 sm:$0xff]  }
  0x3f   :  { %1361 = vmatpush2.bf16.msra.mxu1 %v3467_v35  ;;  %1319 = vmatprep.subr.bf16.mxu0 %v3468_v36  ;;  %v3513_v5 = vld [vmem:[%s4259_s0 + $0x8] ss:$28 sps:$4 sm:$0xff]   ;;  %v3519_v7 = vld [vmem:[#allocation2 + $0x600] ss:$16 sps:$4 sm:$0xff]  }
  0x40   :  { %1362 = vmatprep.subr.bf16.mxu1 %v3470_v37  ;;  %v3524_v8 = vld [vmem:[#allocation2 + $0x4c4] ss:$16 sps:$4 sm:$0xff]   ;;  %v3522_v10 = vld [vmem:[#allocation2 + $0x4c0] ss:$16 sps:$4 sm:$0xff]   ;;  %v3556_v35 = vld [vmem:[#allocation2 + $0x48] ss:$16 sps:$4 sm:$0xff]  }
  0x41   :  { %v3530_v12 = vld [vmem:[#allocation2 + $0x4a4] ss:$16 sps:$4 sm:$0xff]   ;;  %v3528_v15 = vld [vmem:[#allocation2 + $0x4a0] ss:$16 sps:$4 sm:$0xff]   ;;  %v3564_v37 = vld [vmem:[#allocation2 + $0x2c] ss:$16 sps:$4 sm:$0xff]  }
  0x42   :  { %1320 = vmatpush2.bf16.msra.mxu0 %v3472_v38  ;;  %v3537_v17 = vld [vmem:[#allocation2 + $0x484] ss:$16 sps:$4 sm:$0xff]   ;;  %v3535_v19 = vld [vmem:[#allocation2 + $0x480] ss:$16 sps:$4 sm:$0xff]  }
  0x43   :  { %1363 = vmatpush2.bf16.msra.mxu1 %v3473_v39  ;;  %1321 = vmatprep.subr.bf16.mxu0 %v3474_v40  ;;  %v3543_v21 = vld [vmem:[#allocation2 + $0x464] ss:$16 sps:$4 sm:$0xff]   ;;  %v3541_v23 = vld [vmem:[#allocation2 + $0x460] ss:$16 sps:$4 sm:$0xff]   ;;  %v3562_v39 = vld [vmem:[#allocation2 + $0x28] ss:$16 sps:$4 sm:$0xff]  }
  0x44   :  { %1364 = vmatprep.subr.bf16.mxu1 %v3476_v41  ;;  %v3549_v25 = vld [vmem:[#allocation2 + $0x444] ss:$16 sps:$4 sm:$0xff]   ;;  %v3547_v27 = vld [vmem:[#allocation2 + $0x440] ss:$16 sps:$4 sm:$0xff]   ;;  %v3570_v41 = vld [vmem:[#allocation2 + $0xc] ss:$16 sps:$4 sm:$0xff]  }
  0x45   :  { %v3555_v29 = vld [vmem:[#allocation2 + $0x424] ss:$16 sps:$4 sm:$0xff]   ;;  %v3553_v31 = vld [vmem:[#allocation2 + $0x420] ss:$16 sps:$4 sm:$0xff]  }
  0x46   :  { %1322 = vmatpush2.bf16.msra.mxu0 %v3478_v42  ;;  %v4094_v33 = vld [vmem:[%s4259_s0 + $0x14] ss:$28 sps:$4 sm:$0xff]  }
  0x47   :  { %1365 = vmatpush2.bf16.msra.mxu1 %v3479_v43  ;;  %1323 = vmatprep.subr.bf16.mxu0 %v3480_v44  ;;  %v3561_v34 = vld [vmem:[#allocation2 + $0x404] ss:$16 sps:$4 sm:$0xff]   ;;  %v3559_v36 = vld [vmem:[#allocation2 + $0x400] ss:$16 sps:$4 sm:$0xff]   ;;  %v3568_v43 = vld [vmem:[#allocation2 + $0x8] ss:$16 sps:$4 sm:$0xff]  }
  0x48   :  { %1366 = vmatprep.subr.bf16.mxu1 %v3482_v45  ;;  %v3567_v38 = vld [vmem:[#allocation2 + $0x5e4] ss:$16 sps:$4 sm:$0xff]   ;;  %v3565_v40 = vld [vmem:[#allocation2 + $0x5e0] ss:$16 sps:$4 sm:$0xff]   ;;  %v3576_v45 = vld [vmem:[#allocation2 + $0x1ec] ss:$16 sps:$4 sm:$0xff]  }
  0x49   :  { %v3573_v42 = vld [vmem:[#allocation2 + $0x5c4] ss:$16 sps:$4 sm:$0xff]   ;;  %v3571_v44 = vld [vmem:[#allocation2 + $0x5c0] ss:$16 sps:$4 sm:$0xff]  }
  0x4a   :  { %1324 = vmatpush2.bf16.msra.mxu0 %v3484_v46  ;;  %v3579_v46 = vld [vmem:[#allocation2 + $0x5a4] ss:$16 sps:$4 sm:$0xff]  }
  0x4b   :  { %1367 = vmatpush2.bf16.msra.mxu1 %v3485_v47  ;;  %1325 = vmatprep.subr.bf16.mxu0 %v3486_v48  ;;  %v3574_v47 = vld [vmem:[#allocation2 + $0x1e8] ss:$16 sps:$4 sm:$0xff]   ;;  %v3577_v48 = vld [vmem:[#allocation2 + $0x5a0] ss:$16 sps:$4 sm:$0xff]  }
  0x4c   :  { %1368 = vmatprep.subr.bf16.mxu1 %v3488_v50  ;;  %v3585_v50 = vld [vmem:[#allocation2 + $0x584] ss:$16 sps:$4 sm:$0xff]  }
  0x4e   :  { %1326 = vmatpush2.bf16.msra.mxu0 %v3490_v52  ;;  %v3580_v52 = vld [vmem:[#allocation2 + $0x1c8] ss:$16 sps:$4 sm:$0xff]  }
  0x4f   :  { %1369 = vmatpush2.bf16.msra.mxu1 %v3491_v53  ;;  %1327 = vmatprep.subr.bf16.mxu0 %v3492_v54  ;;  %v3583_v53 = vld [vmem:[#allocation2 + $0x580] ss:$16 sps:$4 sm:$0xff]   ;;  %v3588_v54 = vld [vmem:[#allocation2 + $0x1ac] ss:$16 sps:$4 sm:$0xff]  }
  0x50   :  { %1370 = vmatprep.subr.bf16.mxu1 %v3494_v55  ;;  %v3591_v55 = vld [vmem:[#allocation2 + $0x564] ss:$16 sps:$4 sm:$0xff]  }
  0x52   :  { %1328 = vmatpush2.bf16.msra.mxu0 %v3496_v56  ;;  %v3586_v56 = vld [vmem:[#allocation2 + $0x1a8] ss:$16 sps:$4 sm:$0xff]  }
  0x53   :  { %1371 = vmatpush2.bf16.msra.mxu1 %v3497_v57  ;;  %1329 = vmatprep.subr.bf16.mxu0 %v3498_v58  ;;  %v3589_v57 = vld [vmem:[#allocation2 + $0x560] ss:$16 sps:$4 sm:$0xff]   ;;  %v3594_v58 = vld [vmem:[#allocation2 + $0x18c] ss:$16 sps:$4 sm:$0xff]  }
  0x54   :  { %1372 = vmatprep.subr.bf16.mxu1 %v3500_v59  ;;  %v3597_v59 = vld [vmem:[#allocation2 + $0x544] ss:$16 sps:$4 sm:$0xff]  }
  0x56   :  { %1330 = vmatpush2.bf16.msra.mxu0 %v3502_v60  ;;  %v3592_v60 = vld [vmem:[#allocation2 + $0x188] ss:$16 sps:$4 sm:$0xff]  }
  0x57   :  { %1373 = vmatpush2.bf16.msra.mxu1 %v3503_v61  ;;  %1331 = vmatprep.subr.bf16.mxu0 %v3504_v62  ;;  %v3595_v61 = vld [vmem:[#allocation2 + $0x540] ss:$16 sps:$4 sm:$0xff]   ;;  %v3600_v62 = vld [vmem:[#allocation2 + $0x16c] ss:$16 sps:$4 sm:$0xff]  }
  0x58   :  { %1374 = vmatprep.subr.bf16.mxu1 %v3506_v63  ;;  %v3603_v63 = vld [vmem:[#allocation2 + $0x524] ss:$16 sps:$4 sm:$0xff]  }
  0x5a   :  { %1332 = vmatpush2.bf16.msra.mxu0 %v3508_v0  ;;  %v3598_v0 = vld [vmem:[#allocation2 + $0x168] ss:$16 sps:$4 sm:$0xff]  }
  0x5b   :  { %1375 = vmatpush2.bf16.msra.mxu1 %v3509_v1  ;;  %1387 = vmatprep.subr.bf16.mxu0 %v3518_v2  ;;  %v3601_v1 = vld [vmem:[#allocation2 + $0x520] ss:$16 sps:$4 sm:$0xff]   ;;  %v3606_v2 = vld [vmem:[#allocation2 + $0x14c] ss:$16 sps:$4 sm:$0xff]  }
  0x5c   :  { %1444 = vmatprep.subr.bf16.mxu1 %v3521_v3  ;;  %v3609_v3 = vld [vmem:[#allocation2 + $0x504] ss:$16 sps:$4 sm:$0xff]  }
  0x5d   :  { %1334 = vmatmul.mubr.bf16.vlgmr.msra.gmra.mxu0 %v4079_v4 }
  0x5e   :  { %1377 = vmatmul.mubr.bf16.vlgmr.msra.gmra.mxu1 %v3513_v5  ;;  %1388 = vmatpush1.bf16.msra.mxu0 %v3516_v6  ;;  %v3604_v5 = vld [vmem:[#allocation2 + $0x148] ss:$16 sps:$4 sm:$0xff]   ;;  %v3607_v6 = vld [vmem:[#allocation2 + $0x500] ss:$16 sps:$4 sm:$0xff]  }
  0x5f   :  { %1445 = vmatpush1.bf16.msra.mxu1 %v3519_v7  ;;  %1389 = vmatprep.subr.bf16.mxu0 %v3524_v8  ;;  %v3615_v7 = vld [vmem:[#allocation2 + $0x12c] ss:$16 sps:$4 sm:$0xff]  }
  0x60   :  { %1462 = vmatprep.mubr.bf16.mxu1 %v4014_v11  ;;  %1473 = vmatprep.subr.bf16.mxu1 %v3527_v9  ;;  %v3618_v8 = vld [vmem:[#allocation2 + $0x2ec] ss:$16 sps:$4 sm:$0xff]  }
  0x61   :  { %1419 = vmatprep.mubr.bf16.mxu0 %v4094_v33  ;;  %v4100_v9 = vld [vmem:[%s4259_s0 + $0x10] ss:$28 sps:$4 sm:$0xff]  }
  0x62   :  { %1390 = vmatpush1.bf16.msra.mxu0 %v3522_v10  ;;  %v3613_v10 = vld [vmem:[#allocation2 + $0x128] ss:$16 sps:$4 sm:$0xff]  }
  0x63   :  { %1391 = vmatprep.subr.bf16.mxu0 %v3530_v12  ;;  %v3616_v12 = vld [vmem:[#allocation2 + $0x2e8] ss:$16 sps:$4 sm:$0xff]  }
  0x66   :  { %3199 = vmatmul.mubr.msk.bf16.vlgmr.msra.gmra.mxu1 %vm1297_vm0, %v3531_v14  ;;  %1392 = vmatpush1.bf16.msra.mxu0 %v3528_v15  ;;  %v3624_v14 = vld [vmem:[#allocation2 + $0x2cc] ss:$16 sps:$4 sm:$0xff]   ;;  %v3619_v15 = vld [vmem:[#allocation2 + $0x108] ss:$16 sps:$4 sm:$0xff]  }
  0x67   :  { %1474 = vmatpush1.bf16.msra.mxu1 %v3525_v13  ;;  %1393 = vmatprep.subr.bf16.mxu0 %v3537_v17  ;;  %v3621_v13 = vld [vmem:[#allocation2 + $0x10c] ss:$16 sps:$4 sm:$0xff]  }
  0x68   :  { %1475 = vmatprep.subr.bf16.mxu1 %v3534_v16  ;;  %1505 = vmatprep.mubr.bf16.mxu1 %v4067_v49  ;;  %v3582_v49 = vld [vmem:[#allocation2 + $0x1cc] ss:$16 sps:$4 sm:$0xff]   ;;  %v3622_v16 = vld [vmem:[#allocation2 + $0x2c8] ss:$16 sps:$4 sm:$0xff]  }
  0x69   :  { %v3627_v17 = vld [vmem:[#allocation2 + $0x4ec] ss:$16 sps:$4 sm:$0xff]  }
  0x6a   :  { %1394 = vmatpush1.bf16.msra.mxu0 %v3535_v19  ;;  %v3625_v19 = vld [vmem:[#allocation2 + $0x4e8] ss:$16 sps:$4 sm:$0xff]  }
  0x6b   :  { %1476 = vmatpush1.bf16.msra.mxu1 %v3532_v18  ;;  %1395 = vmatprep.subr.bf16.mxu0 %v3543_v21  ;;  %v3630_v18 = vld [vmem:[#allocation2 + $0x2ac] ss:$16 sps:$4 sm:$0xff]  }
  0x6c   :  { %1477 = vmatprep.subr.bf16.mxu1 %v3540_v20  ;;  %v3628_v20 = vld [vmem:[#allocation2 + $0x2a8] ss:$16 sps:$4 sm:$0xff]   ;;  %v3633_v21 = vld [vmem:[#allocation2 + $0x4cc] ss:$16 sps:$4 sm:$0xff]  }
  0x6e   :  { %1396 = vmatpush1.bf16.msra.mxu0 %v3541_v23  ;;  %v3631_v23 = vld [vmem:[#allocation2 + $0x4c8] ss:$16 sps:$4 sm:$0xff]  }
  0x6f   :  { %1478 = vmatpush1.bf16.msra.mxu1 %v3538_v22  ;;  %1397 = vmatprep.subr.bf16.mxu0 %v3549_v25  ;;  %v3636_v22 = vld [vmem:[#allocation2 + $0x28c] ss:$16 sps:$4 sm:$0xff]  }
  0x70   :  { %1479 = vmatprep.subr.bf16.mxu1 %v3546_v24  ;;  %v3634_v24 = vld [vmem:[#allocation2 + $0x288] ss:$16 sps:$4 sm:$0xff]   ;;  %v3639_v25 = vld [vmem:[#allocation2 + $0x4ac] ss:$16 sps:$4 sm:$0xff]  }
  0x72   :  { %1398 = vmatpush1.bf16.msra.mxu0 %v3547_v27  ;;  %v3637_v27 = vld [vmem:[#allocation2 + $0x4a8] ss:$16 sps:$4 sm:$0xff]  }
  0x73   :  { %1480 = vmatpush1.bf16.msra.mxu1 %v3544_v26  ;;  %1399 = vmatprep.subr.bf16.mxu0 %v3555_v29  ;;  %v3642_v26 = vld [vmem:[#allocation2 + $0x26c] ss:$16 sps:$4 sm:$0xff]  }
  0x74   :  { %1481 = vmatprep.subr.bf16.mxu1 %v3552_v28  ;;  %v3640_v28 = vld [vmem:[#allocation2 + $0x268] ss:$16 sps:$4 sm:$0xff]   ;;  %v3648_v29 = vld [vmem:[#allocation2 + $0x24c] ss:$16 sps:$4 sm:$0xff]  }
  0x76   :  { %1400 = vmatpush1.bf16.msra.mxu0 %v3553_v31  ;;  %v3651_v31 = vld [vmem:[#allocation2 + $0x46c] ss:$16 sps:$4 sm:$0xff]  }
  0x77   :  { %1482 = vmatpush1.bf16.msra.mxu1 %v3550_v30  ;;  %1401 = vmatprep.subr.bf16.mxu0 %v3561_v34  ;;  %v3643_v30 = vld [vmem:[#allocation2 + $0x488] ss:$16 sps:$4 sm:$0xff]  }
  0x78   :  { %1483 = vmatprep.subr.bf16.mxu1 %v3558_v32  ;;  %v3654_v32 = vld [vmem:[#allocation2 + $0x22c] ss:$16 sps:$4 sm:$0xff]   ;;  %v3649_v34 = vld [vmem:[#allocation2 + $0x468] ss:$16 sps:$4 sm:$0xff]  }
  0x7a   :  { %1402 = vmatpush1.bf16.msra.mxu0 %v3559_v36  ;;  %v3660_v36 = vld [vmem:[#allocation2 + $0x20c] ss:$16 sps:$4 sm:$0xff]  }
  0x7b   :  { %1484 = vmatpush1.bf16.msra.mxu1 %v3556_v35  ;;  %1403 = vmatprep.subr.bf16.mxu0 %v3567_v38  ;;  %v3652_v35 = vld [vmem:[#allocation2 + $0x228] ss:$16 sps:$4 sm:$0xff]  }
  0x7c   :  { %1485 = vmatprep.subr.bf16.mxu1 %v3564_v37  ;;  %v3655_v37 = vld [vmem:[#allocation2 + $0x448] ss:$16 sps:$4 sm:$0xff]  }
  0x7d   :  { %v3658_v38 = vld [vmem:[#allocation2 + $0x208] ss:$16 sps:$4 sm:$0xff]  }
  0x7e   :  { %1404 = vmatpush2.bf16.msra.mxu0 %v3565_v40  ;;  %v3666_v40 = vld [vmem:[#allocation2 + $0x3ec] ss:$16 sps:$4 sm:$0xff]  }
  0x7f   :  { %1486 = vmatpush1.bf16.msra.mxu1 %v3562_v39  ;;  %1405 = vmatprep.subr.bf16.mxu0 %v3573_v42  ;;  %v3663_v39 = vld [vmem:[#allocation2 + $0x42c] ss:$16 sps:$4 sm:$0xff]   ;;  %v3664_v42 = vld [vmem:[#allocation2 + $0x3e8] ss:$16 sps:$4 sm:$0xff]  }
  0x80   :  { %1487 = vmatprep.subr.bf16.mxu1 %v3570_v41  ;;  %v3661_v41 = vld [vmem:[#allocation2 + $0x428] ss:$16 sps:$4 sm:$0xff]  }
  0x82   :  { %1406 = vmatpush2.bf16.msra.mxu0 %v3571_v44  ;;  %v3672_v44 = vld [vmem:[#allocation2 + $0x3cc] ss:$16 sps:$4 sm:$0xff]  }
  0x83   :  { %1488 = vmatpush1.bf16.msra.mxu1 %v3568_v43  ;;  %1407 = vmatprep.subr.bf16.mxu0 %v3579_v46  ;;  %v3669_v43 = vld [vmem:[#allocation2 + $0x40c] ss:$16 sps:$4 sm:$0xff]   ;;  %v3670_v46 = vld [vmem:[#allocation2 + $0x3c8] ss:$16 sps:$4 sm:$0xff]  }
  0x84   :  { %1489 = vmatprep.subr.bf16.mxu1 %v3576_v45  ;;  %v3667_v45 = vld [vmem:[#allocation2 + $0x408] ss:$16 sps:$4 sm:$0xff]  }
  0x86   :  { %1408 = vmatpush2.bf16.msra.mxu0 %v3577_v48  ;;  %v3678_v48 = vld [vmem:[#allocation2 + $0x3ac] ss:$16 sps:$4 sm:$0xff]  }
  0x87   :  { %1490 = vmatpush2.bf16.msra.mxu1 %v3574_v47  ;;  %1409 = vmatprep.subr.bf16.mxu0 %v3585_v50  ;;  %v3675_v47 = vld [vmem:[#allocation2 + $0x5ec] ss:$16 sps:$4 sm:$0xff]   ;;  %v3676_v50 = vld [vmem:[#allocation2 + $0x3a8] ss:$16 sps:$4 sm:$0xff]  }
  0x88   :  { %1491 = vmatprep.subr.bf16.mxu1 %v3582_v49  ;;  %v3673_v49 = vld [vmem:[#allocation2 + $0x5e8] ss:$16 sps:$4 sm:$0xff]  }
  0x8a   :  { %1410 = vmatpush2.bf16.msra.mxu0 %v3583_v53  ;;  %v3684_v53 = vld [vmem:[#allocation2 + $0x38c] ss:$16 sps:$4 sm:$0xff]  }
  0x8b   :  { %1492 = vmatpush2.bf16.msra.mxu1 %v3580_v52  ;;  %1411 = vmatprep.subr.bf16.mxu0 %v3591_v55  ;;  %v3681_v52 = vld [vmem:[#allocation2 + $0x5cc] ss:$16 sps:$4 sm:$0xff]   ;;  %v3682_v55 = vld [vmem:[#allocation2 + $0x388] ss:$16 sps:$4 sm:$0xff]  }
  0x8c   :  { %1493 = vmatprep.subr.bf16.mxu1 %v3588_v54  ;;  %v3679_v54 = vld [vmem:[#allocation2 + $0x5c8] ss:$16 sps:$4 sm:$0xff]  }
  0x8e   :  { %1412 = vmatpush2.bf16.msra.mxu0 %v3589_v57  ;;  %v3690_v57 = vld [vmem:[#allocation2 + $0x36c] ss:$16 sps:$4 sm:$0xff]  }
  0x8f   :  { %1494 = vmatpush2.bf16.msra.mxu1 %v3586_v56  ;;  %1413 = vmatprep.subr.bf16.mxu0 %v3597_v59  ;;  %v3687_v56 = vld [vmem:[#allocation2 + $0x5ac] ss:$16 sps:$4 sm:$0xff]   ;;  %v3688_v59 = vld [vmem:[#allocation2 + $0x368] ss:$16 sps:$4 sm:$0xff]  }
  0x90   :  { %1495 = vmatprep.subr.bf16.mxu1 %v3594_v58  ;;  %v3685_v58 = vld [vmem:[#allocation2 + $0x5a8] ss:$16 sps:$4 sm:$0xff]  }
  0x92   :  { %1414 = vmatpush2.bf16.msra.mxu0 %v3595_v61  ;;  %v3696_v61 = vld [vmem:[#allocation2 + $0x34c] ss:$16 sps:$4 sm:$0xff]  }
  0x93   :  { %1496 = vmatpush2.bf16.msra.mxu1 %v3592_v60  ;;  %1415 = vmatprep.subr.bf16.mxu0 %v3603_v63  ;;  %v3693_v60 = vld [vmem:[#allocation2 + $0x58c] ss:$16 sps:$4 sm:$0xff]   ;;  %v3694_v63 = vld [vmem:[#allocation2 + $0x348] ss:$16 sps:$4 sm:$0xff]  }
  0x94   :  { %1497 = vmatprep.subr.bf16.mxu1 %v3600_v62  ;;  %v3691_v62 = vld [vmem:[#allocation2 + $0x588] ss:$16 sps:$4 sm:$0xff]  }
  0x96   :  { %1416 = vmatpush2.bf16.msra.mxu0 %v3601_v1  ;;  %v3702_v1 = vld [vmem:[#allocation2 + $0x32c] ss:$16 sps:$4 sm:$0xff]  }
  0x97   :  { %1498 = vmatpush2.bf16.msra.mxu1 %v3598_v0  ;;  %1417 = vmatprep.subr.bf16.mxu0 %v3609_v3  ;;  %v3699_v0 = vld [vmem:[#allocation2 + $0x56c] ss:$16 sps:$4 sm:$0xff]   ;;  %v3700_v3 = vld [vmem:[#allocation2 + $0x328] ss:$16 sps:$4 sm:$0xff]  }
  0x98   :  { %1499 = vmatprep.subr.bf16.mxu1 %v3606_v2  ;;  %v3697_v2 = vld [vmem:[#allocation2 + $0x568] ss:$16 sps:$4 sm:$0xff]  }
  0x9a   :  { %1418 = vmatpush2.bf16.msra.mxu0 %v3607_v6  ;;  %v3708_v6 = vld [vmem:[#allocation2 + $0x30c] ss:$16 sps:$4 sm:$0xff]  }
  0x9b   :  { %1500 = vmatpush2.bf16.msra.mxu1 %v3604_v5  ;;  %1516 = vmatprep.subr.bf16.mxu0 %v3618_v8  ;;  %v3705_v5 = vld [vmem:[#allocation2 + $0x54c] ss:$16 sps:$4 sm:$0xff]   ;;  %v3706_v8 = vld [vmem:[#allocation2 + $0x308] ss:$16 sps:$4 sm:$0xff]  }
  0x9c   :  { %1501 = vmatprep.subr.bf16.mxu1 %v3615_v7  ;;  %v3703_v7 = vld [vmem:[#allocation2 + $0x548] ss:$16 sps:$4 sm:$0xff]  }
  0x9d   :  { %1420 = vmatmul.mubr.bf16.vlgmr.msra.gmra.mxu0 %v4100_v9 }
  0x9e   :  { %1517 = vmatpush1.bf16.msra.mxu0 %v3616_v12  ;;  %1548 = vmatprep.mubr.bf16.mxu0 %v4072_v51  ;;  %v3645_v51 = vld [vmem:[#allocation2 + $0x48c] ss:$16 sps:$4 sm:$0xff]  }
  0x9f   :  { %1502 = vmatpush2.bf16.msra.mxu1 %v3613_v10  ;;  %1518 = vmatprep.subr.bf16.mxu0 %v3624_v14  ;;  %v3711_v10 = vld [vmem:[#allocation2 + $0x52c] ss:$16 sps:$4 sm:$0xff]   ;;  %v3712_v14 = vld [vmem:[#allocation2 + $0x608] ss:$16 sps:$4 sm:$0xff]  }
  0xa0   :  { %1503 = vmatprep.subr.bf16.mxu1 %v3621_v13  ;;  %v3714_v12 = vld [vmem:[#allocation2 + $0x60c] ss:$16 sps:$4 sm:$0xff]   ;;  %v3709_v13 = vld [vmem:[#allocation2 + $0x528] ss:$16 sps:$4 sm:$0xff]  }
  0xa2   :  { %1519 = vmatpush1.bf16.msra.mxu0 %v3622_v16  ;;  %v3720_v16 = vld [vmem:[#allocation5 + $0xe4] ss:$16 sps:$4 sm:$0xff]  }
  0xa3   :  { %1504 = vmatpush2.bf16.msra.mxu1 %v3619_v15  ;;  %1520 = vmatprep.subr.bf16.mxu0 %v3630_v18  ;;  %v3717_v15 = vld [vmem:[#allocation2 + $0x50c] ss:$16 sps:$4 sm:$0xff]   ;;  %v3942_v18 = vld [vmem:[%s4259_s0 + $0x8] ss:$28 sps:$4 sm:$0xff]  }
  0xa4   :  { %1559 = vmatprep.subr.bf16.mxu1 %v3627_v17  ;;  %v3715_v17 = vld [vmem:[#allocation2 + $0x508] ss:$16 sps:$4 sm:$0xff]  }
  0xa6   :  { %1506 = vmatmul.mubr.bf16.vlgmr.msra.gmra.mxu1 %v4079_v4  ;;  %1521 = vmatpush1.bf16.msra.mxu0 %v3628_v20  ;;  %v3646_v4 = vld [vmem:[#allocation2 + $0x248] ss:$16 sps:$4 sm:$0xff]   ;;  %v3723_v20 = vld [vmem:[#allocation5 + $0xc4] ss:$16 sps:$4 sm:$0xff]  }
  0xa7   :  { %1560 = vmatpush1.bf16.msra.mxu1 %v3625_v19  ;;  %1522 = vmatprep.subr.bf16.mxu0 %v3636_v22  ;;  %v3718_v19 = vld [vmem:[#allocation5 + $0xe0] ss:$16 sps:$4 sm:$0xff]   ;;  %v3943_v22 = vld [vmem:[%s4259_s0 + $0x18] ss:$28 sps:$4 sm:$0xff]  }
  0xa8   :  { %1561 = vmatprep.subr.bf16.mxu1 %v3633_v21  ;;  %1591 = vmatprep.mubr.bf16.mxu1 %v4094_v33  ;;  %v3657_v33 = vld [vmem:[#allocation2 + $0x44c] ss:$16 sps:$4 sm:$0xff]   ;;  %v3721_v21 = vld [vmem:[#allocation5 + $0xc0] ss:$16 sps:$4 sm:$0xff]  }
  0xaa   :  { %1523 = vmatpush1.bf16.msra.mxu0 %v3634_v24  ;;  %v3724_v24 = vld [vmem:[#allocation5 + $0xa0] ss:$16 sps:$4 sm:$0xff]  }
  0xab   :  { %1562 = vmatpush1.bf16.msra.mxu1 %v3631_v23  ;;  %1524 = vmatprep.subr.bf16.mxu0 %v3642_v26  ;;  %v3726_v23 = vld [vmem:[#allocation5 + $0xa4] ss:$16 sps:$4 sm:$0xff]  }
  0xac   :  { %1563 = vmatprep.subr.bf16.mxu1 %v3639_v25  ;;  %v3727_v25 = vld [vmem:[#allocation5 + $0x80] ss:$16 sps:$4 sm:$0xff]   ;;  %v3732_v26 = vld [vmem:[#allocation5 + $0x64] ss:$16 sps:$4 sm:$0xff]  }
  0xae   :  { %1525 = vmatpush1.bf16.msra.mxu0 %v3640_v28  ;;  %v3774_v28 = vld [vmem:[#allocation5 + $0x2e4] ss:$16 sps:$4 sm:$0xff]  }
  0xaf   :  { %1564 = vmatpush1.bf16.msra.mxu1 %v3637_v27  ;;  %1526 = vmatprep.subr.bf16.mxu0 %v3648_v29  ;;  %v3730_v27 = vld [vmem:[#allocation5 + $0x60] ss:$16 sps:$4 sm:$0xff]  }
  0xb0   :  { %1565 = vmatprep.subr.bf16.mxu1 %v3645_v51  ;;  %v3735_v51 = vld [vmem:[#allocation5 + $0x44] ss:$16 sps:$4 sm:$0xff]   ;;  %v3733_v29 = vld [vmem:[#allocation5 + $0x40] ss:$16 sps:$4 sm:$0xff]  }
  0xb2   :  { %1527 = vmatpush1.bf16.msra.mxu0 %v3646_v4  ;;  %v3780_v4 = vld [vmem:[#allocation5 + $0x2c4] ss:$16 sps:$4 sm:$0xff]  }
  0xb3   :  { %1566 = vmatpush1.bf16.msra.mxu1 %v3643_v30  ;;  %1528 = vmatprep.subr.bf16.mxu0 %v3654_v32  ;;  %v3778_v30 = vld [vmem:[#allocation5 + $0x2c0] ss:$16 sps:$4 sm:$0xff]  }
  0xb4   :  { %1567 = vmatprep.subr.bf16.mxu1 %v3651_v31  ;;  %v3738_v31 = vld [vmem:[#allocation5 + $0x24] ss:$16 sps:$4 sm:$0xff]   ;;  %v3736_v32 = vld [vmem:[#allocation5 + $0x20] ss:$16 sps:$4 sm:$0xff]  }
  0xb6   :  { %1529 = vmatpush1.bf16.msra.mxu0 %v3652_v35  ;;  %v3786_v35 = vld [vmem:[#allocation5 + $0x2a4] ss:$16 sps:$4 sm:$0xff]  }
  0xb7   :  { %1568 = vmatpush1.bf16.msra.mxu1 %v3649_v34  ;;  %1530 = vmatprep.subr.bf16.mxu0 %v3660_v36  ;;  %v3784_v34 = vld [vmem:[#allocation5 + $0x2a0] ss:$16 sps:$4 sm:$0xff]  }
  0xb8   :  { %1569 = vmatprep.subr.bf16.mxu1 %v3657_v33  ;;  %v3741_v33 = vld [vmem:[#allocation5 + $0x4] ss:$16 sps:$4 sm:$0xff]   ;;  %v3739_v36 = vld [vmem:[#allocation5] ss:$16 sps:$4 sm:$0xff]  }
  0xba   :  { %1531 = vmatpush1.bf16.msra.mxu0 %v3658_v38  ;;  %v3792_v38 = vld [vmem:[#allocation5 + $0x284] ss:$16 sps:$4 sm:$0xff]  }
  0xbb   :  { %1570 = vmatpush1.bf16.msra.mxu1 %v3655_v37  ;;  %1532 = vmatprep.subr.bf16.mxu0 %v3666_v40  ;;  %v3790_v37 = vld [vmem:[#allocation5 + $0x280] ss:$16 sps:$4 sm:$0xff]  }
  0xbc   :  { %1571 = vmatprep.subr.bf16.mxu1 %v3663_v39  ;;  %v3744_v39 = vld [vmem:[#allocation5 + $0x1e4] ss:$16 sps:$4 sm:$0xff]   ;;  %v3742_v40 = vld [vmem:[#allocation5 + $0x1e0] ss:$16 sps:$4 sm:$0xff]  }
  0xbe   :  { %1533 = vmatpush2.bf16.msra.mxu0 %v3664_v42  ;;  %v3798_v42 = vld [vmem:[#allocation5 + $0x264] ss:$16 sps:$4 sm:$0xff]  }
  0xbf   :  { %1572 = vmatpush1.bf16.msra.mxu1 %v3661_v41  ;;  %1534 = vmatprep.subr.bf16.mxu0 %v3672_v44  ;;  %v3796_v41 = vld [vmem:[#allocation5 + $0x260] ss:$16 sps:$4 sm:$0xff]  }
  0xc0   :  { %1573 = vmatprep.subr.bf16.mxu1 %v3669_v43  ;;  %v3747_v43 = vld [vmem:[#allocation5 + $0x1c4] ss:$16 sps:$4 sm:$0xff]   ;;  %v3745_v44 = vld [vmem:[#allocation5 + $0x1c0] ss:$16 sps:$4 sm:$0xff]  }
  0xc2   :  { %1535 = vmatpush2.bf16.msra.mxu0 %v3670_v46  ;;  %v3804_v46 = vld [vmem:[#allocation5 + $0x244] ss:$16 sps:$4 sm:$0xff]  }
  0xc3   :  { %1574 = vmatpush1.bf16.msra.mxu1 %v3667_v45  ;;  %1536 = vmatprep.subr.bf16.mxu0 %v3678_v48  ;;  %v3802_v45 = vld [vmem:[#allocation5 + $0x240] ss:$16 sps:$4 sm:$0xff]  }
  0xc4   :  { %1575 = vmatprep.subr.bf16.mxu1 %v3675_v47  ;;  %v3750_v47 = vld [vmem:[#allocation5 + $0x1a4] ss:$16 sps:$4 sm:$0xff]   ;;  %v3748_v48 = vld [vmem:[#allocation5 + $0x1a0] ss:$16 sps:$4 sm:$0xff]  }
  0xc6   :  { %1537 = vmatpush2.bf16.msra.mxu0 %v3676_v50  ;;  %v3810_v50 = vld [vmem:[#allocation5 + $0x224] ss:$16 sps:$4 sm:$0xff]  }
  0xc7   :  { %1576 = vmatpush2.bf16.msra.mxu1 %v3673_v49  ;;  %1538 = vmatprep.subr.bf16.mxu0 %v3684_v53  ;;  %v3808_v49 = vld [vmem:[#allocation5 + $0x220] ss:$16 sps:$4 sm:$0xff]  }
  0xc8   :  { %1577 = vmatprep.subr.bf16.mxu1 %v3681_v52  ;;  %v3753_v52 = vld [vmem:[#allocation5 + $0x184] ss:$16 sps:$4 sm:$0xff]   ;;  %v3751_v53 = vld [vmem:[#allocation5 + $0x180] ss:$16 sps:$4 sm:$0xff]  }
  0xca   :  { %1539 = vmatpush2.bf16.msra.mxu0 %v3682_v55  ;;  %v3816_v55 = vld [vmem:[#allocation5 + $0x204] ss:$16 sps:$4 sm:$0xff]  }
  0xcb   :  { %1578 = vmatpush2.bf16.msra.mxu1 %v3679_v54  ;;  %1540 = vmatprep.subr.bf16.mxu0 %v3690_v57  ;;  %v3814_v54 = vld [vmem:[#allocation5 + $0x200] ss:$16 sps:$4 sm:$0xff]  }
  0xcc   :  { %1579 = vmatprep.subr.bf16.mxu1 %v3687_v56  ;;  %v3756_v56 = vld [vmem:[#allocation5 + $0x164] ss:$16 sps:$4 sm:$0xff]   ;;  %v3754_v57 = vld [vmem:[#allocation5 + $0x160] ss:$16 sps:$4 sm:$0xff]  }
  0xce   :  { %1541 = vmatpush2.bf16.msra.mxu0 %v3688_v59  ;;  %v3822_v59 = vld [vmem:[#allocation5 + $0x3e4] ss:$16 sps:$4 sm:$0xff]  }
  0xcf   :  { %1580 = vmatpush2.bf16.msra.mxu1 %v3685_v58  ;;  %1542 = vmatprep.subr.bf16.mxu0 %v3696_v61  ;;  %v3820_v58 = vld [vmem:[#allocation5 + $0x3e0] ss:$16 sps:$4 sm:$0xff]  }
  0xd0   :  { %1581 = vmatprep.subr.bf16.mxu1 %v3693_v60  ;;  %v3759_v60 = vld [vmem:[#allocation5 + $0x144] ss:$16 sps:$4 sm:$0xff]   ;;  %v3757_v61 = vld [vmem:[#allocation5 + $0x140] ss:$16 sps:$4 sm:$0xff]  }
  0xd2   :  { %1543 = vmatpush2.bf16.msra.mxu0 %v3694_v63  ;;  %v3828_v63 = vld [vmem:[#allocation5 + $0x3c4] ss:$16 sps:$4 sm:$0xff]  }
  0xd3   :  { %1582 = vmatpush2.bf16.msra.mxu1 %v3691_v62  ;;  %1544 = vmatprep.subr.bf16.mxu0 %v3702_v1  ;;  %v3826_v62 = vld [vmem:[#allocation5 + $0x3c0] ss:$16 sps:$4 sm:$0xff]  }
  0xd4   :  { %1583 = vmatprep.subr.bf16.mxu1 %v3699_v0  ;;  %v3762_v0 = vld [vmem:[#allocation5 + $0x124] ss:$16 sps:$4 sm:$0xff]   ;;  %v3760_v1 = vld [vmem:[#allocation5 + $0x120] ss:$16 sps:$4 sm:$0xff]  }
  0xd6   :  { %1545 = vmatpush2.bf16.msra.mxu0 %v3700_v3  ;;  %v3834_v3 = vld [vmem:[#allocation5 + $0x3a4] ss:$16 sps:$4 sm:$0xff]  }
  0xd7   :  { %1584 = vmatpush2.bf16.msra.mxu1 %v3697_v2  ;;  %1546 = vmatprep.subr.bf16.mxu0 %v3708_v6  ;;  %v3832_v2 = vld [vmem:[#allocation5 + $0x3a0] ss:$16 sps:$4 sm:$0xff]  }
  0xd8   :  { %1585 = vmatprep.subr.bf16.mxu1 %v3705_v5  ;;  %v3765_v5 = vld [vmem:[#allocation5 + $0x104] ss:$16 sps:$4 sm:$0xff]   ;;  %v3763_v6 = vld [vmem:[#allocation5 + $0x100] ss:$16 sps:$4 sm:$0xff]  }
  0xda   :  { %1547 = vmatpush2.bf16.msra.mxu0 %v3706_v8  ;;  %v3768_v8 = vld [vmem:[#allocation5 + $0xec] ss:$16 sps:$4 sm:$0xff]  }
  0xdb   :  { %1586 = vmatpush2.bf16.msra.mxu1 %v3703_v7  ;;  %1616 = vmatprep.subr.bf16.mxu0 %v3714_v12  ;;  %v3840_v7 = vld [vmem:[#allocation5 + $0x384] ss:$16 sps:$4 sm:$0xff]  }
  0xdc   :  { %1587 = vmatprep.subr.bf16.mxu1 %v3711_v10  ;;  %v3838_v10 = vld [vmem:[#allocation5 + $0x380] ss:$16 sps:$4 sm:$0xff]   ;;  %v3846_v12 = vld [vmem:[#allocation5 + $0x364] ss:$16 sps:$4 sm:$0xff]  }
  0xdd   :  { %1549 = vmatmul.mubr.bf16.vlgmr.msra.gmra.mxu0 %v3942_v18  ;;  %v3861_v18 = vld [vmem:[#allocation5 + $0x304] ss:$16 sps:$4 sm:$0xff]  }
  0xde   :  { %1617 = vmatpush1.bf16.msra.mxu0 %v3712_v14  ;;  %1634 = vmatprep.mubr.bf16.mxu0 %v4014_v11  ;;  %v3729_v11 = vld [vmem:[#allocation5 + $0x84] ss:$16 sps:$4 sm:$0xff]  }
  0xdf   :  { %1588 = vmatpush2.bf16.msra.mxu1 %v3709_v13  ;;  %2447 = vmatprep.subr.bf16.mxu0 %v3720_v16  ;;  %v3844_v13 = vld [vmem:[#allocation5 + $0x360] ss:$16 sps:$4 sm:$0xff]   ;;  %v3852_v14 = vld [vmem:[#allocation5 + $0x344] ss:$16 sps:$4 sm:$0xff]  }
  0xe0   :  { %1589 = vmatprep.subr.bf16.mxu1 %v3717_v15  ;;  %v3850_v15 = vld [vmem:[#allocation5 + $0x340] ss:$16 sps:$4 sm:$0xff]   ;;  %v3858_v16 = vld [vmem:[#allocation5 + $0x324] ss:$16 sps:$4 sm:$0xff]  }
  0xe3   :  { %1590 = vmatpush2.bf16.msra.mxu1 %v3715_v17  ;;  %v3856_v17 = vld [vmem:[#allocation5 + $0x320] ss:$16 sps:$4 sm:$0xff]  }
  0xe4   :  { %2490 = vmatprep.subr.bf16.mxu1 %v3774_v28  ;;  %v4122_v28 = vld [vmem:[%s4261_s2] sm:$0xf] }
  0xe5   :  { %3200 = vmatmul.mubr.msk.bf16.vlgmr.msra.gmra.mxu0 %vm1297_vm0, %v3943_v22  ;;  %v262_v22 = vlaneseq }
  0xe6   :  { %1592 = vmatmul.mubr.bf16.vlgmr.msra.gmra.mxu1 %v4100_v9  ;;  %2448 = vmatpush1.bf16.msra.mxu0 %v3718_v19  ;;  %v3772_v9 = vld [vmem:[#allocation5 + $0x2e0] ss:$16 sps:$4 sm:$0xff]  }
  0xe7   :  { %2449 = vmatprep.subr.bf16.mxu0 %v3723_v20  ;;  %2491 = vmatpush1.bf16.msra.mxu1 %v3772_v9  ;;  %v3859_v19 = vld [vmem:[#allocation5 + $0x300] ss:$16 sps:$4 sm:$0xff]   ;;  %v3864_v20 = vld [vmem:[#allocation5 + $0x2ec] ss:$16 sps:$4 sm:$0xff]  }
  0xe8   :  { %2492 = vmatprep.subr.bf16.mxu1 %v3780_v4 }
  0xea   :  { %2450 = vmatpush1.bf16.msra.mxu0 %v3721_v21 }
  0xeb   :  { %2451 = vmatprep.subr.bf16.mxu0 %v3726_v23  ;;  %2493 = vmatpush1.bf16.msra.mxu1 %v3778_v30 }
  0xec   :  { %2494 = vmatprep.subr.bf16.mxu1 %v3786_v35 }
  0xee   :  { %2452 = vmatpush1.bf16.msra.mxu0 %v3724_v24  ;;  %v4115_v24 = vshrl.u32 %v262_v22, 7  ;;  %v3823_v22 = vld [vmem:[#allocation5 + $0x1a8] ss:$16 sps:$4 sm:$0xff]  }
  0xef   :  { %2453 = vmatprep.subr.bf16.mxu0 %v3729_v11  ;;  %2495 = vmatpush1.bf16.msra.mxu1 %v3784_v34 }
  0xf0   :  { %2496 = vmatprep.subr.bf16.mxu1 %v3792_v38 }
  0xf2   :  { %2454 = vmatpush1.bf16.msra.mxu0 %v3727_v25 }
  0xf3   :  { %2455 = vmatprep.subr.bf16.mxu0 %v3732_v26  ;;  %2497 = vmatpush1.bf16.msra.mxu1 %v3790_v37  ;;  %v268_v26 = vsub.s32 1, %v4115_v24 }
  0xf4   :  { %2498 = vmatprep.subr.bf16.mxu1 %v3798_v42 }
  0xf6   :  { %2456 = vmatpush1.bf16.msra.mxu0 %v3730_v27  ;;  %v264_v27 = vsub.s32 0, %v4115_v24 }
  0xf7   :  { %2457 = vmatprep.subr.bf16.mxu0 %v3735_v51  ;;  %2499 = vmatpush1.bf16.msra.mxu1 %v3796_v41 }
  0xf8   :  { %2500 = vmatprep.subr.bf16.mxu1 %v3804_v46  ;;  %v265_v30 = vrot.slane %v4122_v28, %v264_v27 }
  0xfa   :  { %2458 = vmatpush1.bf16.msra.mxu0 %v3733_v29  ;;  %v269_v29 = vrot.slane %v4122_v28, %v268_v26 }
  0xfb   :  { %2459 = vmatprep.subr.bf16.mxu0 %v3738_v31  ;;  %2501 = vmatpush1.bf16.msra.mxu1 %v3802_v45 }
  0xfc   :  { %2502 = vmatprep.subr.bf16.mxu1 %v3810_v50 }
  0xfe   :  { %2460 = vmatpush1.bf16.msra.mxu0 %v3736_v32 }
  0xff   :  { %2461 = vmatprep.subr.bf16.mxu0 %v3741_v33  ;;  %2503 = vmatpush1.bf16.msra.mxu1 %v3808_v49 }
 0x100   :  { %2504 = vmatprep.subr.bf16.mxu1 %v3816_v55 }
 0x102   :  { %2462 = vmatpush1.bf16.msra.mxu0 %v3739_v36 }
 0x103   :  { %2463 = vmatprep.subr.bf16.mxu0 %v3744_v39  ;;  %2505 = vmatpush1.bf16.msra.mxu1 %v3814_v54 }
 0x104   :  { %2506 = vmatprep.subr.bf16.mxu1 %v3822_v59 }
 0x106   :  { %2464 = vmatpush2.bf16.msra.mxu0 %v3742_v40 }
 0x107   :  { %2465 = vmatprep.subr.bf16.mxu0 %v3747_v43  ;;  %2507 = vmatpush2.bf16.msra.mxu1 %v3820_v58 }
 0x108   :  { %2508 = vmatprep.subr.bf16.mxu1 %v3828_v63 }
 0x10a   :  { %2466 = vmatpush2.bf16.msra.mxu0 %v3745_v44 }
 0x10b   :  { %2467 = vmatprep.subr.bf16.mxu0 %v3750_v47  ;;  %2509 = vmatpush2.bf16.msra.mxu1 %v3826_v62  ;;  %v3766_v62 = vld [vmem:[#allocation5 + $0xe8] ss:$16 sps:$4 sm:$0xff]  }
 0x10c   :  { %2510 = vmatprep.subr.bf16.mxu1 %v3834_v3  ;;  %v3775_v3 = vld [vmem:[#allocation5 + $0xa8] ss:$16 sps:$4 sm:$0xff]  }
 0x10e   :  { %2468 = vmatpush2.bf16.msra.mxu0 %v3748_v48 }
 0x10f   :  { %2469 = vmatprep.subr.bf16.mxu0 %v3753_v52  ;;  %2511 = vmatpush2.bf16.msra.mxu1 %v3832_v2  ;;  %v3777_v2 = vld [vmem:[#allocation5 + $0xac] ss:$16 sps:$4 sm:$0xff]  }
 0x110   :  { %2512 = vmatprep.subr.bf16.mxu1 %v3840_v7  ;;  %v3789_v7 = vld [vmem:[#allocation5 + $0x6c] ss:$16 sps:$4 sm:$0xff]  }
 0x112   :  { %2470 = vmatpush2.bf16.msra.mxu0 %v3751_v53 }
 0x113   :  { %2471 = vmatprep.subr.bf16.mxu0 %v3756_v56  ;;  %2513 = vmatpush2.bf16.msra.mxu1 %v3838_v10  ;;  %v3795_v10 = vld [vmem:[#allocation5 + $0x4c] ss:$16 sps:$4 sm:$0xff]  }
 0x114   :  { %2514 = vmatprep.subr.bf16.mxu1 %v3846_v12  ;;  %v3793_v12 = vld [vmem:[#allocation5 + $0x48] ss:$16 sps:$4 sm:$0xff]  }
 0x116   :  { %2472 = vmatpush2.bf16.msra.mxu0 %v3754_v57 }
 0x117   :  { %2473 = vmatprep.subr.bf16.mxu0 %v3759_v60  ;;  %2515 = vmatpush2.bf16.msra.mxu1 %v3844_v13  ;;  %v3801_v13 = vld [vmem:[#allocation5 + $0x2c] ss:$16 sps:$4 sm:$0xff]  }
 0x118   :  { %2516 = vmatprep.subr.bf16.mxu1 %v3852_v14  ;;  %v3799_v14 = vld [vmem:[#allocation5 + $0x28] ss:$16 sps:$4 sm:$0xff]  }
 0x11a   :  { %2474 = vmatpush2.bf16.msra.mxu0 %v3757_v61 }
 0x11b   :  { %2475 = vmatprep.subr.bf16.mxu0 %v3762_v0  ;;  %2517 = vmatpush2.bf16.msra.mxu1 %v3850_v15  ;;  %v3771_v0 = vld [vmem:[#allocation5 + $0xcc] ss:$16 sps:$4 sm:$0xff]  }
 0x11c   :  { %2518 = vmatprep.subr.bf16.mxu1 %v3858_v16  ;;  %v3807_v15 = vld [vmem:[#allocation5 + $0xc] ss:$16 sps:$4 sm:$0xff]   ;;  %v3805_v16 = vld [vmem:[#allocation5 + $0x8] ss:$16 sps:$4 sm:$0xff]  }
 0x11d   :  { %v1335_v11 = vpop.f32.mrf.mxu0 }
 0x11e   :  { %2476 = vmatpush2.bf16.msra.mxu0 %v3760_v1  ;;  %v1378_v21 = vpop.f32.mrf.mxu1  ;;  %v1336_v34 = vadd.f32 %v1335_v11, %v265_v30  ;;  %v3769_v1 = vld [vmem:[#allocation5 + $0xc8] ss:$16 sps:$4 sm:$0xff]  }
 0x11f   :  { %2477 = vmatprep.subr.bf16.mxu0 %v3765_v5  ;;  %2519 = vmatpush2.bf16.msra.mxu1 %v3856_v17  ;;  %v1337_v9 = vpop.f32.mrf.mxu0  ;;  %v3783_v5 = vld [vmem:[#allocation5 + $0x8c] ss:$16 sps:$4 sm:$0xff]   ;;  %v3829_v11 = vld [vmem:[#allocation5 + $0x188] ss:$16 sps:$4 sm:$0xff]  }
 0x120   :  { %2520 = vmatprep.subr.bf16.mxu1 %v3861_v18  ;;  %v1380_v23 = vpop.f32.mrf.mxu1  ;;  %v1338_v32 = vadd.f32 %v1337_v9, %v269_v29  ;;  %v1379_v40 = vadd.f32 %v1378_v21, %v1336_v34  ;;  %v3813_v17 = vld [vmem:[#allocation5 + $0x1ec] ss:$16 sps:$4 sm:$0xff]   ;;  %v3811_v18 = vld [vmem:[#allocation5 + $0x1e8] ss:$16 sps:$4 sm:$0xff]  }
 0x121   :  { %v1339_v4 = vpop.f32.mrf.mxu0  ;;  %v3825_v21 = vld [vmem:[#allocation5 + $0x1ac] ss:$16 sps:$4 sm:$0xff]   ;;  %v3841_v34 = vld [vmem:[#allocation5 + $0x148] ss:$16 sps:$4 sm:$0xff]  }
 0x122   :  { %2478 = vmatpush2.bf16.msra.mxu0 %v3763_v6  ;;  %v1382_v25 = vpop.f32.mrf.mxu1  ;;  %v1340_v33 = vadd.f32 %v1339_v4, %v265_v30  ;;  %v1381_v38 = vadd.f32 %v1380_v23, %v1338_v32  ;;  %v3781_v6 = vld [vmem:[#allocation5 + $0x88] ss:$16 sps:$4 sm:$0xff]   ;;  %v3831_v23 = vld [vmem:[#allocation5 + $0x18c] ss:$16 sps:$4 sm:$0xff]   ;;  %v276_v4 = vsub.s32 3, %v4115_v24 }
 0x123   :  { %2533 = vmatprep.subr.bf16.mxu0 %v3768_v8  ;;  %2521 = vmatpush2.bf16.msra.mxu1 %v3859_v19  ;;  %v1341_v35 = vpop.f32.mrf.mxu0  ;;  %v3787_v8 = vld [vmem:[#allocation5 + $0x68] ss:$16 sps:$4 sm:$0xff]   ;;  %v3819_v19 = vld [vmem:[#allocation5 + $0x1cc] ss:$16 sps:$4 sm:$0xff]  }
 0x124   :  { %2576 = vmatprep.subr.bf16.mxu1 %v3864_v20  ;;  %v1384_v51 = vpop.f32.mrf.mxu1  ;;  %v1342_v39 = vadd.f32 %v1341_v35, %v269_v29  ;;  %v1383_v42 = vadd.f32 %v1382_v25, %v1340_v33  ;;  %v3817_v20 = vld [vmem:[#allocation5 + $0x1c8] ss:$16 sps:$4 sm:$0xff]   ;;  %v3837_v9 = vld [vmem:[#allocation5 + $0x16c] ss:$16 sps:$4 sm:$0xff]  }
 0x125   :  { %v3843_v30 = vld [vmem:[#allocation5 + $0x14c] ss:$16 sps:$4 sm:$0xff]  }
 0x126   :  { %v1464_v31 = vpop.f32.mrf.mxu1  ;;  %v1385_v47 = vadd.f32 %v1384_v51, %v1342_v39  ;;  %v3835_v51 = vld [vmem:[#allocation5 + $0x168] ss:$16 sps:$4 sm:$0xff]  }
 0x128   :  { %v1466_v36 = vpop.f32.mrf.mxu1 }
 0x12a   :  { %v1468_v44 = vpop.f32.mrf.mxu1 }
 0x12c   :  { %v1470_v54 = vpop.f32.mrf.mxu1 }
 0x15d   :  { %v1421_v37 = vpop.f32.mrf.mxu0 }
 0x15e   :  { %v1422_v45 = vadd.f32 %v1421_v37, %v1379_v40  ;;  %v277_v37 = vrot.slane %v4122_v28, %v276_v4  ;;  %v3847_v40 = vld [vmem:[#allocation5 + $0x128] ss:$16 sps:$4 sm:$0xff]  }
 0x15f   :  { %v1423_v41 = vpop.f32.mrf.mxu0 }
 0x160   :  { %v1424_v43 = vadd.f32 %v1423_v41, %v1381_v38  ;;  %v1465_v55 = vadd.f32 %v1464_v31, %v1422_v45  ;;  %v272_v31 = vsub.s32 2, %v4115_v24 }
 0x161   :  { %v1425_v46 = vpop.f32.mrf.mxu0 }
 0x162   :  { %v1426_v48 = vadd.f32 %v1425_v46, %v1383_v42  ;;  %v1467_v50 = vadd.f32 %v1466_v36, %v1424_v43  ;;  %v1645_v60 = vmax.f32 %v1465_v55, 0.0  ;;  %v3849_v36 = vld [vmem:[#allocation5 + $0x12c] ss:$16 sps:$4 sm:$0xff]   ;;  %v273_v38 = vrot.slane %v4122_v28, %v272_v31 }
 0x163   :  { %v1427_v49 = vpop.f32.mrf.mxu0  ;;  %v3855_v43 = vld [vmem:[#allocation5 + $0x10c] ss:$16 sps:$4 sm:$0xff]  }
 0x164   :  { %v1469_v52 = vadd.f32 %v1468_v44, %v1426_v48  ;;  %v1428_v53 = vadd.f32 %v1427_v49, %v1385_v47  ;;  %v1646_v58 = vmax.f32 %v1467_v50, 0.0  ;;  %v3853_v50 = vld [vmem:[#allocation5 + $0x108] ss:$16 sps:$4 sm:$0xff]  }
 0x166   :  { %v1471_v56 = vadd.f32 %v1470_v54, %v1428_v53  ;;  %v1649_v57 = vmax.f32 %v1469_v52, 0.0  ;;  %v1507_v25 = vpop.f32.mrf.mxu1 }
 0x167   :  { %v1508_v45 = vadd.f32 %v1507_v25, %v273_v38  ;;  %v3915_v25 = vld [vmem:[%s4264_s5 + $0x28] sm:$0xff]  }
 0x168   :  { %v1650_v59 = vmax.f32 %v1471_v56, 0.0  ;;  %v4130_v63 = vpack.c.bf16 %v1649_v57, %v1645_v60  ;;  %v1509_v29 = vpop.f32.mrf.mxu1 }
 0x169   :  { %v1510_v44 = vadd.f32 %v1509_v29, %v277_v37  ;;  %v3874_v29 = vld [vmem:[#allocation5 + $0x268] ss:$16 sps:$4 sm:$0xff]  }
 0x16a   :  { %v1654_v61 = vpack.c.bf16 %v1650_v59, %v1646_v58  ;;  %v1511_v35 = vpop.f32.mrf.mxu1 }
 0x16b   :  { %v1512_v48 = vadd.f32 %v1511_v35, %v273_v38  ;;  %v3880_v35 = vld [vmem:[#allocation5 + $0x228] ss:$16 sps:$4 sm:$0xff]  }
 0x16c   :  { %2479 = vmatprep.mubr.bf16.mxu0 %v1654_v61  ;;  %v1513_v41 = vpop.f32.mrf.mxu1  ;;  %v3886_v38 = vld [vmem:[#allocation5 + $0x3e8] ss:$16 sps:$4 sm:$0xff]  }
 0x16d   :  { %2480 = vmatmul.mubr.bf16.vlgmr.msra.gmra.mxu0 %v4130_v63  ;;  %v1514_v28 = vadd.f32 %v1513_v41, %v277_v37  ;;  %v3888_v37 = vld [vmem:[#allocation5 + $0x3ec] ss:$16 sps:$4 sm:$0xff]  }
 0x16e   :  { %2534 = vmatpush1.bf16.msra.mxu0 %v3766_v62  ;;  %2565 = vmatprep.mubr.bf16.mxu0 %v1654_v61  ;;  %v3894_v41 = vld [vmem:[#allocation5 + $0x3ac] ss:$16 sps:$4 sm:$0xff]  }
 0x16f   :  { %2535 = vmatprep.subr.bf16.mxu0 %v3771_v0 }
 0x172   :  { %2536 = vmatpush1.bf16.msra.mxu0 %v3769_v1 }
 0x173   :  { %2537 = vmatprep.subr.bf16.mxu0 %v3777_v2 }
 0x176   :  { %2538 = vmatpush1.bf16.msra.mxu0 %v3775_v3 }
 0x177   :  { %2539 = vmatprep.subr.bf16.mxu0 %v3783_v5 }
 0x17a   :  { %2540 = vmatpush1.bf16.msra.mxu0 %v3781_v6 }
 0x17b   :  { %2541 = vmatprep.subr.bf16.mxu0 %v3789_v7 }
 0x17e   :  { %2542 = vmatpush1.bf16.msra.mxu0 %v3787_v8 }
 0x17f   :  { %2543 = vmatprep.subr.bf16.mxu0 %v3795_v10 }
 0x182   :  { %2544 = vmatpush1.bf16.msra.mxu0 %v3793_v12 }
 0x183   :  { %2545 = vmatprep.subr.bf16.mxu0 %v3801_v13 }
 0x186   :  { %2546 = vmatpush1.bf16.msra.mxu0 %v3799_v14  ;;  %v3862_v14 = vld [vmem:[#allocation5 + $0x2e8] ss:$16 sps:$4 sm:$0xff]  }
 0x187   :  { %2547 = vmatprep.subr.bf16.mxu0 %v3807_v15 }
 0x18a   :  { %2548 = vmatpush1.bf16.msra.mxu0 %v3805_v16  ;;  %v3867_v16 = vld [vmem:[#allocation5 + $0x2cc] ss:$16 sps:$4 sm:$0xff]  }
 0x18b   :  { %2549 = vmatprep.subr.bf16.mxu0 %v3813_v17  ;;  %v3910_v17 = vld [vmem:[%s4264_s5 + $0x78] sm:$0xff]  }
 0x18e   :  { %2550 = vmatpush2.bf16.msra.mxu0 %v3811_v18  ;;  %v3911_v18 = vld [vmem:[%s4264_s5 + $0x38] sm:$0xff]  }
 0x18f   :  { %2551 = vmatprep.subr.bf16.mxu0 %v3819_v19  ;;  %v3865_v19 = vld [vmem:[#allocation5 + $0x2c8] ss:$16 sps:$4 sm:$0xff]  }
 0x192   :  { %2552 = vmatpush2.bf16.msra.mxu0 %v3817_v20  ;;  %v3870_v20 = vld [vmem:[#allocation5 + $0x2ac] ss:$16 sps:$4 sm:$0xff]  }
 0x193   :  { %2553 = vmatprep.subr.bf16.mxu0 %v3825_v21  ;;  %v3913_v21 = vld [vmem:[%s4264_s5 + $0x30] sm:$0xff]  }
 0x196   :  { %2554 = vmatpush2.bf16.msra.mxu0 %v3823_v22  ;;  %v3914_v22 = vld [vmem:[%s4264_s5 + $0x68] sm:$0xff]  }
 0x197   :  { %2555 = vmatprep.subr.bf16.mxu0 %v3831_v23  ;;  %v3868_v23 = vld [vmem:[#allocation5 + $0x2a8] ss:$16 sps:$4 sm:$0xff]  }
 0x19a   :  { %2556 = vmatpush2.bf16.msra.mxu0 %v3829_v11  ;;  %v3873_v11 = vld [vmem:[#allocation5 + $0x28c] ss:$16 sps:$4 sm:$0xff]  }
 0x19b   :  { %2557 = vmatprep.subr.bf16.mxu0 %v3837_v9  ;;  %v3871_v9 = vld [vmem:[#allocation5 + $0x288] ss:$16 sps:$4 sm:$0xff]  }
 0x19d   :  { %v1550_v32 = vpop.f32.mrf.mxu0 }
 0x19e   :  { %2558 = vmatpush2.bf16.msra.mxu0 %v3835_v51  ;;  %v1551_v52 = vadd.f32 %v1550_v32, %v1508_v45  ;;  %v3876_v51 = vld [vmem:[#allocation5 + $0x26c] ss:$16 sps:$4 sm:$0xff]   ;;  %v3877_v32 = vld [vmem:[#allocation5 + $0x248] ss:$16 sps:$4 sm:$0xff]  }
 0x19f   :  { %v1552_v33 = vpop.f32.mrf.mxu0  ;;  %2559 = vmatprep.subr.bf16.mxu0 %v3843_v30  ;;  %v3879_v30 = vld [vmem:[#allocation5 + $0x24c] ss:$16 sps:$4 sm:$0xff]  }
 0x1a0   :  { %v1553_v49 = vadd.f32 %v1552_v33, %v1510_v44  ;;  %v3885_v33 = vld [vmem:[#allocation5 + $0x20c] ss:$16 sps:$4 sm:$0xff]   ;;  %v3895_v44 = vld [vmem:[#allocation5 + $0x388] ss:$16 sps:$4 sm:$0xff]  }
 0x1a1   :  { %v1554_v39 = vpop.f32.mrf.mxu0  ;;  %v3900_v45 = vld [vmem:[#allocation5 + $0x36c] ss:$16 sps:$4 sm:$0xff]  }
 0x1a2   :  { %2560 = vmatpush2.bf16.msra.mxu0 %v3841_v34  ;;  %v1555_v55 = vadd.f32 %v1554_v39, %v1512_v48  ;;  %v3882_v34 = vld [vmem:[#allocation5 + $0x22c] ss:$16 sps:$4 sm:$0xff]   ;;  %v3901_v48 = vld [vmem:[#allocation5 + $0x348] ss:$16 sps:$4 sm:$0xff]  }
 0x1a3   :  { %v1556_v42 = vpop.f32.mrf.mxu0  ;;  %2561 = vmatprep.subr.bf16.mxu0 %v3849_v36  ;;  %v3883_v36 = vld [vmem:[#allocation5 + $0x208] ss:$16 sps:$4 sm:$0xff]   ;;  %v3891_v39 = vld [vmem:[#allocation5 + $0x3cc] ss:$16 sps:$4 sm:$0xff]  }
 0x1a4   :  { %v1557_v60 = vadd.f32 %v1556_v42, %v1514_v28  ;;  %v3892_v42 = vld [vmem:[#allocation5 + $0x3a8] ss:$16 sps:$4 sm:$0xff]   ;;  %v3917_v28 = vld [vmem:[%s4264_s5 + $0x20] sm:$0xff]  }
 0x1a5   :  { %v1636_v47 = vpop.f32.mrf.mxu0 }
 0x1a6   :  { %v1593_v46 = vpop.f32.mrf.mxu1  ;;  %2562 = vmatpush2.bf16.msra.mxu0 %v3847_v40  ;;  %v3889_v40 = vld [vmem:[#allocation5 + $0x3c8] ss:$16 sps:$4 sm:$0xff]  }
 0x1a7   :  { %v1638_v54 = vpop.f32.mrf.mxu0  ;;  %2563 = vmatprep.subr.bf16.mxu0 %v3855_v43  ;;  %v1594_v57 = vadd.f32 %v1593_v46, %v1551_v52  ;;  %v3897_v43 = vld [vmem:[#allocation5 + $0x38c] ss:$16 sps:$4 sm:$0xff]   ;;  %v3898_v46 = vld [vmem:[#allocation5 + $0x368] ss:$16 sps:$4 sm:$0xff]  }
 0x1a8   :  { %v1595_v53 = vpop.f32.mrf.mxu1  ;;  %v3909_v52 = vld [vmem:[#allocation5 + $0x30c] ss:$16 sps:$4 sm:$0xff]  }
 0x1a9   :  { %v1596_v56 = vadd.f32 %v1595_v53, %v1553_v49  ;;  %v1640_v59 = vpop.f32.mrf.mxu0  ;;  %v1637_v5 = vadd.f32 %v1636_v47, %v1594_v57  ;;  %v3903_v47 = vld [vmem:[#allocation5 + $0x34c] ss:$16 sps:$4 sm:$0xff]   ;;  %v3907_v53 = vld [vmem:[#allocation5 + $0x308] ss:$16 sps:$4 sm:$0xff]   ;;  %v3920_v57 = vld [vmem:[%s4264_s5 + $0x50] sm:$0xff]  }
 0x1aa   :  { %v1597_v58 = vpop.f32.mrf.mxu1  ;;  %2564 = vmatpush2.bf16.msra.mxu0 %v3853_v50  ;;  %v3906_v49 = vld [vmem:[#allocation5 + $0x32c] ss:$16 sps:$4 sm:$0xff]   ;;  %v3904_v50 = vld [vmem:[#allocation5 + $0x328] ss:$16 sps:$4 sm:$0xff]  }
 0x1ab   :  { %v1598_v61 = vadd.f32 %v1597_v58, %v1555_v55  ;;  %v1642_v0 = vpop.f32.mrf.mxu0  ;;  %v1639_v1 = vadd.f32 %v1638_v54, %v1596_v56  ;;  %v1647_v12 = vmax.f32 %v1637_v5, 0.0  ;;  %3362 = vmatprep.subr.bf16.mxu0 %v3910_v17  ;;  %v3916_v54 = vld [vmem:[%s4264_s5 + $0x60] sm:$0xff]   ;;  %v3918_v55 = vld [vmem:[%s4264_s5 + $0x58] sm:$0xff]   ;;  %v3921_v58 = vld [vmem:[%s4264_s5 + $0x10] sm:$0xff]  }
 0x1ac   :  { %v1599_v62 = vpop.f32.mrf.mxu1  ;;  %v3919_v56 = vld [vmem:[%s4264_s5 + $0x18] sm:$0xff]   ;;  %v3930_v5 = vld [vmem:[%s4264_s5 + $0xe8] sm:$0xff]   ;;  %v3940_v17 = vld [vmem:[%s4264_s5 + $0xc0] sm:$0xff]  }
 0x1ad   :  { %v1641_v2 = vadd.f32 %v1640_v59, %v1598_v61  ;;  %v1600_v3 = vadd.f32 %v1599_v62, %v1557_v60  ;;  %2566 = vmatmul.mubr.bf16.vlgmr.msra.gmra.mxu0 %v4130_v63  ;;  %v1648_v8 = vmax.f32 %v1639_v1, 0.0  ;;  %v3912_v63 = vld [vmem:[%s4264_s5 + $0x70] sm:$0xff]   ;;  %v3922_v59 = vld [vmem:[%s4264_s5 + $0x48] sm:$0xff]   ;;  %v3924_v61 = vld [vmem:[%s4264_s5 + $0x40] sm:$0xff]  }
 0x1ae   :  { %3363 = vmatpush3.bf16.msra.mxu0 %v3911_v18  ;;  %v3923_v60 = vld [vmem:[%s4264_s5 + $0x8] sm:$0xff]   ;;  %v3925_v62 = vld [vmem:[%s4264_s5] sm:$0xff]   ;;  %v3927_v1 = vld [vmem:[%s4264_s5 + $0xb8] sm:$0xff]  }
 0x1af   :  { %v1643_v6 = vadd.f32 %v1642_v0, %v1600_v3  ;;  %v1651_v7 = vmax.f32 %v1641_v2, 0.0  ;;  %3364 = vmatprep.subr.bf16.mxu0 %v3912_v63  ;;  %v3926_v0 = vld [vmem:[%s4264_s5 + $0xf8] sm:$0xff]   ;;  %v3928_v2 = vld [vmem:[%s4264_s5 + $0xf0] sm:$0xff]   ;;  %v3941_v18 = vld [vmem:[%s4264_s5 + $0x80] sm:$0xff]  }
 0x1b0   :  { %v3929_v3 = vld [vmem:[%s4264_s5 + $0xb0] sm:$0xff]  }
 0x1b1   :  { %v1652_v10 = vmax.f32 %v1643_v6, 0.0  ;;  %v4142_v15 = vpack.c.bf16 %v1651_v7, %v1647_v12  ;;  %v3931_v6 = vld [vmem:[%s4264_s5 + $0xa8] sm:$0xff]   ;;  %v3932_v7 = vld [vmem:[%s4264_s5 + $0xe0] sm:$0xff]   ;;  %v3935_v12 = vld [vmem:[%s4264_s5 + $0x98] sm:$0xff]  }
 0x1b2   :  { %3365 = vmatpush3.bf16.msra.mxu0 %v3913_v21 }
 0x1b3   :  { %v1656_v13 = vpack.c.bf16 %v1652_v10, %v1648_v8  ;;  %3366 = vmatprep.subr.bf16.mxu0 %v3914_v22  ;;  %v3933_v8 = vld [vmem:[%s4264_s5 + $0xa0] sm:$0xff]   ;;  %v3934_v10 = vld [vmem:[%s4264_s5 + $0xd8] sm:$0xff]  }
 0x1b5   :  { %2522 = vmatprep.mubr.bf16.mxu1 %v1656_v13 }
 0x1b6   :  { %2523 = vmatmul.mubr.bf16.vlgmr.msra.gmra.mxu1 %v4142_v15  ;;  %3367 = vmatpush3.bf16.msra.mxu0 %v3915_v25 }
 0x1b7   :  { %2577 = vmatpush1.bf16.msra.mxu1 %v3862_v14  ;;  %2608 = vmatprep.mubr.bf16.mxu1 %v1656_v13  ;;  %v3936_v13 = vld [vmem:[%s4264_s5 + $0xd0] sm:$0xff]  }
 0x1b8   :  { %2578 = vmatprep.subr.bf16.mxu1 %v3867_v16  ;;  %3368 = vmatprep.subr.bf16.mxu0 %v3916_v54  ;;  %v3937_v14 = vld [vmem:[%s4264_s5 + $0x90] sm:$0xff]   ;;  %v3939_v16 = vld [vmem:[%s4264_s5 + $0x88] sm:$0xff]  }
 0x1ba   :  { %3369 = vmatpush3.bf16.msra.mxu0 %v3917_v28 }
 0x1bb   :  { %2579 = vmatpush1.bf16.msra.mxu1 %v3865_v19  ;;  %3370 = vmatprep.subr.bf16.mxu0 %v3918_v55 }
 0x1bc   :  { %2580 = vmatprep.subr.bf16.mxu1 %v3870_v20  ;;  %v1785_v20 = vld [vmem:[%s4263_s4] sm:$0xf] }
 0x1bd   :  { %v1794_v22 = vrot.slane %v1785_v20, %v268_v26 }
 0x1be   :  { %3371 = vmatpush3.bf16.msra.mxu0 %v3919_v56 }
 0x1bf   :  { %2581 = vmatpush1.bf16.msra.mxu1 %v3868_v23  ;;  %3372 = vmatprep.subr.bf16.mxu0 %v3920_v57  ;;  %v1790_v23 = vrot.slane %v1785_v20, %v264_v27 }
 0x1c0   :  { %2582 = vmatprep.subr.bf16.mxu1 %v3873_v11 }
 0x1c2   :  { %3373 = vmatpush3.bf16.msra.mxu0 %v3921_v58 }
 0x1c3   :  { %2583 = vmatpush1.bf16.msra.mxu1 %v3871_v9  ;;  %3374 = vmatprep.subr.bf16.mxu0 %v3922_v59 }
 0x1c4   :  { %2584 = vmatprep.subr.bf16.mxu1 %v3876_v51 }
 0x1c6   :  { %3375 = vmatpush3.bf16.msra.mxu0 %v3923_v60 }
 0x1c7   :  { %2585 = vmatpush1.bf16.msra.mxu1 %v3874_v29  ;;  %3376 = vmatprep.subr.bf16.mxu0 %v3924_v61 }
 0x1c8   :  { %2586 = vmatprep.subr.bf16.mxu1 %v3879_v30 }
 0x1ca   :  { %3377 = vmatpush3.bf16.msra.mxu0 %v3925_v62 }
 0x1cb   :  { %2587 = vmatpush1.bf16.msra.mxu1 %v3877_v32 }
 0x1cc   :  { %2588 = vmatprep.subr.bf16.mxu1 %v3882_v34 }
 0x1cf   :  { %2589 = vmatpush1.bf16.msra.mxu1 %v3880_v35 }
 0x1d0   :  { %2590 = vmatprep.subr.bf16.mxu1 %v3885_v33 }
 0x1d3   :  { %2591 = vmatpush1.bf16.msra.mxu1 %v3883_v36 }
 0x1d4   :  { %2592 = vmatprep.subr.bf16.mxu1 %v3888_v37 }
 0x1d7   :  { %2593 = vmatpush2.bf16.msra.mxu1 %v3886_v38 }
 0x1d8   :  { %2594 = vmatprep.subr.bf16.mxu1 %v3891_v39 }
 0x1db   :  { %2595 = vmatpush2.bf16.msra.mxu1 %v3889_v40 }
 0x1dc   :  { %2596 = vmatprep.subr.bf16.mxu1 %v3894_v41 }
 0x1df   :  { %2597 = vmatpush2.bf16.msra.mxu1 %v3892_v42 }
 0x1e0   :  { %2598 = vmatprep.subr.bf16.mxu1 %v3897_v43 }
 0x1e3   :  { %2599 = vmatpush2.bf16.msra.mxu1 %v3895_v44 }
 0x1e4   :  { %2600 = vmatprep.subr.bf16.mxu1 %v3900_v45 }
 0x1e7   :  { %2601 = vmatpush2.bf16.msra.mxu1 %v3898_v46  ;;  %v1802_v46 = vrot.slane %v1785_v20, %v276_v4 }
 0x1e8   :  { %2602 = vmatprep.subr.bf16.mxu1 %v3903_v47  ;;  %v1798_v47 = vrot.slane %v1785_v20, %v272_v31 }
 0x1eb   :  { %2603 = vmatpush2.bf16.msra.mxu1 %v3901_v48 }
 0x1ec   :  { %2604 = vmatprep.subr.bf16.mxu1 %v3906_v49 }
 0x1ef   :  { %2605 = vmatpush2.bf16.msra.mxu1 %v3904_v50 }
 0x1f0   :  { %2606 = vmatprep.subr.bf16.mxu1 %v3909_v52 }
 0x1f3   :  { %2607 = vmatpush2.bf16.msra.mxu1 %v3907_v53 }
 0x1f4   :  { %3384 = vmatprep.subr.bf16.mxu1 %v3926_v0 }
 0x1f6   :  { %2609 = vmatmul.mubr.bf16.vlgmr.msra.gmra.mxu1 %v4142_v15  ;;  %v3938_v15 = vld [vmem:[%s4264_s5 + $0xc8] sm:$0xff]  }
 0x1f7   :  { %3385 = vmatpush3.bf16.msra.mxu1 %v3927_v1 }
 0x1f8   :  { %3386 = vmatprep.subr.bf16.mxu1 %v3928_v2 }
 0x1fb   :  { %3387 = vmatpush3.bf16.msra.mxu1 %v3929_v3 }
 0x1fc   :  { %3388 = vmatprep.subr.bf16.mxu1 %v3930_v5 }
 0x1ff   :  { %3389 = vmatpush3.bf16.msra.mxu1 %v3931_v6  ;;  %v3329_v6 = vld [vmem:[%s4265_s6] ss:$0 sm:$0xff] }
 0x200   :  { %3390 = vmatprep.subr.bf16.mxu1 %v3932_v7 }
 0x203   :  { %3391 = vmatpush3.bf16.msra.mxu1 %v3933_v8 }
 0x204   :  { %3392 = vmatprep.subr.bf16.mxu1 %v3934_v10 }
 0x207   :  { %3393 = vmatpush3.bf16.msra.mxu1 %v3935_v12 }
 0x208   :  { %3394 = vmatprep.subr.bf16.mxu1 %v3936_v13 }
 0x20b   :  { %3395 = vmatpush3.bf16.msra.mxu1 %v3937_v14 }
 0x20c   :  { %3396 = vmatprep.subr.bf16.mxu1 %v3938_v15 }
 0x20f   :  { %3397 = vmatpush3.bf16.msra.mxu1 %v3939_v16 }
 0x210   :  { %3398 = vmatprep.subr.bf16.mxu1 %v3940_v17 }
 0x213   :  { %3399 = vmatpush3.bf16.msra.mxu1 %v3941_v18 }
 0x22d   :  { %v2481_v63 = vpop.f32.mrf.mxu0 }
 0x22e   :  { %v2482_v30 = vadd.f32 %v2481_v63, %v1790_v23 }
 0x22f   :  { %v2483_v19 = vpop.f32.mrf.mxu0 }
 0x230   :  { %v2484_v51 = vadd.f32 %v2483_v19, %v1794_v22 }
 0x231   :  { %v2485_v21 = vpop.f32.mrf.mxu0 }
 0x232   :  { %v2486_v29 = vadd.f32 %v2485_v21, %v1790_v23 }
 0x233   :  { %v2487_v25 = vpop.f32.mrf.mxu0 }
 0x234   :  { %v2488_v34 = vadd.f32 %v2487_v25, %v1794_v22 }
 0x26d   :  { %v2567_v27 = vpop.f32.mrf.mxu0 }
 0x26e   :  { %v2568_v54 = vadd.f32 %v2567_v27, %v1798_v47 }
 0x26f   :  { %v2569_v44 = vpop.f32.mrf.mxu0 }
 0x270   :  { %v2570_v52 = vadd.f32 %v2569_v44, %v1802_v46 }
 0x271   :  { %v2571_v45 = vpop.f32.mrf.mxu0 }
 0x272   :  { %v2572_v53 = vadd.f32 %v2571_v45, %v1798_v47 }
 0x273   :  { %v2573_v49 = vpop.f32.mrf.mxu0 }
 0x274   :  { %v2574_v55 = vadd.f32 %v2573_v49, %v1802_v46 }
 0x276   :  { %v2524_v11 = vpop.f32.mrf.mxu1 }
 0x277   :  { %v2525_v36 = vadd.f32 %v2524_v11, %v2482_v30 }
 0x278   :  { %v2526_v9 = vpop.f32.mrf.mxu1 }
 0x279   :  { %v2527_v35 = vadd.f32 %v2526_v9, %v2484_v51  ;;  %v2619_v26 = vmax.f32 %v2525_v36, 0.0 }
 0x27a   :  { %v2528_v32 = vpop.f32.mrf.mxu1 }
 0x27b   :  { %v2529_v33 = vadd.f32 %v2528_v32, %v2486_v29  ;;  %v2620_v40 = vmax.f32 %v2527_v35, 0.0 }
 0x27c   :  { %v2530_v37 = vpop.f32.mrf.mxu1 }
 0x27d   :  { %v2531_v38 = vadd.f32 %v2530_v37, %v2488_v34  ;;  %v2623_v39 = vmax.f32 %v2529_v33, 0.0 }
 0x27f   :  { %v2624_v41 = vmax.f32 %v2531_v38, 0.0  ;;  %v2627_v43 = vpack.c.bf16 %v2623_v39, %v2619_v26 }
 0x281   :  { %v2628_v42 = vpack.c.bf16 %v2624_v41, %v2620_v40 }
 0x283   :  { %2926 = vmatprep.mubr.bf16.mxu0 %v2628_v42 }
 0x284   :  { %2927 = vmatmul.mubr.bf16.vlgmr.msra.gmra.mxu0 %v2627_v43 }
 0x2b6   :  { %v2610_v48 = vpop.f32.mrf.mxu1 }
 0x2b7   :  { %v2611_v58 = vadd.f32 %v2610_v48, %v2568_v54 }
 0x2b8   :  { %v2612_v50 = vpop.f32.mrf.mxu1 }
 0x2b9   :  { %v2613_v56 = vadd.f32 %v2612_v50, %v2570_v52  ;;  %v2621_v4 = vmax.f32 %v2611_v58, 0.0 }
 0x2ba   :  { %v2614_v28 = vpop.f32.mrf.mxu1 }
 0x2bb   :  { %v2615_v57 = vadd.f32 %v2614_v28, %v2572_v53  ;;  %v2622_v62 = vmax.f32 %v2613_v56, 0.0 }
 0x2bc   :  { %v2616_v59 = vpop.f32.mrf.mxu1 }
 0x2bd   :  { %v2617_v60 = vadd.f32 %v2616_v59, %v2574_v55  ;;  %v2625_v61 = vmax.f32 %v2615_v57, 0.0 }
 0x2bf   :  { %v2626_v0 = vmax.f32 %v2617_v60, 0.0  ;;  %v2629_v24 = vpack.c.bf16 %v2625_v61, %v2621_v4 }
 0x2c1   :  { %v2630_v1 = vpack.c.bf16 %v2626_v0, %v2622_v62 }
 0x2c3   :  { %2967 = vmatprep.mubr.bf16.mxu1 %v2630_v1 }
 0x2c4   :  { %2968 = vmatmul.mubr.bf16.vlgmr.msra.gmra.mxu1 %v2629_v24 }
 0x344   :  { %v3378_v31 = vpop.f32.mrf.mxu0 }
 0x346   :  { %v3379_v2 = vpop.f32.mrf.mxu0 }
 0x347   :  { %v3380_v5 = vadd.f32 %v3379_v2, %v3378_v31 }
 0x348   :  { %v3381_v3 = vpop.f32.mrf.mxu0 }
 0x349   :  { %v2929_v12 = vadd.f32 %v3380_v5, %v3329_v6 }
 0x34a   :  { %v3382_v7 = vpop.f32.mrf.mxu0 }
 0x34b   :  { %v3383_v13 = vadd.f32 %v3382_v7, %v3381_v3 }
 0x34d   :  { %v2932_v18 = vadd.f32 %v3383_v13, %v3329_v6 }
 0x384   :  { %v3400_v8 = vpop.f32.mrf.mxu1 }
 0x386   :  { %v3401_v10 = vpop.f32.mrf.mxu1 }
 0x387   :  { %v3402_v14 = vadd.f32 %v3401_v10, %v3400_v8 }
 0x388   :  { %v3403_v15 = vpop.f32.mrf.mxu1 }
 0x389   :  { %v2970_v16 = vadd.f32 %v3402_v14, %v2929_v12 }
 0x38a   :  { %v3404_v17 = vpop.f32.mrf.mxu1 }
 0x38b   :  { %2976 = vst [vmem:[#allocation7] sm:$0xff] %v2970_v16  ;;  %v3405_v63 = vadd.f32 %v3404_v17, %v3403_v15 }
 0x38d   :  { %v2973_v19 = vadd.f32 %v3405_v63, %v2932_v18 }
 0x38f   :  { %2977 = vst [vmem:[#allocation7 + $0x8] sm:$0xff] %v2973_v19 }
 0x390   :  { %3995 = shalt.err (!%p3992_p0)
}
 0x391   :  { %s4016_s6 = smov 128   ;;  %s4017_s19 = smov 8  }
 0x392   :  { %2989 = dma.vmem_to_hbm [thread:$0]  %s2984_s17, 256, %s4266_s7, [#allocation4], %s4016_s6, %s4016_s6, %s4017_s19  }
 0x393   :  { %4008 = dma.done.wait [#allocation4], 256  }
 0x394   :  { %4009 = vsyncadd [#allocation4], 4294967040 }
 0x395   :  { %2993 = vsyncpa [#allocation3], 1 }
 0x396   :  { %2994 = vsyncpa [#allocation6], 1 }
 0x397   :  { %2995 = vsyncpa [#allocation4], 1 }

</bundles_post_ra>
